<compile_context>
chip_gen: v7x
topology: tpu7x:2x2x1
jax: 0.10.0
libtpu: 0.0.40
codegen_flags: <defaults>
</compile_context>

<pallas_src>
import math
import functools

import jax
import jax.numpy as jnp
from jax.experimental import pallas as pl
from jax.experimental.pallas import tpu as pltpu

LN_EPS = 1e-5  # torch.nn.LayerNorm default


def _layernorm(x, gamma, beta):
    x = x.astype(jnp.float32)
    mean = jnp.mean(x, axis=-1, keepdims=True)
    var = jnp.mean(jnp.square(x - mean), axis=-1, keepdims=True)
    return (x - mean) * jax.lax.rsqrt(var + LN_EPS) * gamma + beta


# ----------------------------- fused kernel ----------------------------------

def _fused_kernel(x_ref, w_emb_ref, emb_vec_ref, pe_ref, after_vec_ref,
                  w_qkv_ref, b_qkv_ref, w_o_ref, w1_ref, b1_ref, w2_ref,
                  vec_ref, o_ref, *, n_heads, xscale):
    l = pl.program_id(1)
    n_layers = pl.num_programs(1)

    # ---- layer 0 only: embed (Linear -> LN -> ReLU) + abs positional enc ----
    @pl.when(l == 0)
    def _():
        ev = emb_vec_ref[...]                         # (3, D): [b_emb, ln_g, ln_b]
        x_in = x_ref[...].astype(jnp.bfloat16)        # (T, Din)
        h = (jnp.dot(x_in, w_emb_ref[...],
                     preferred_element_type=jnp.float32) + ev[0:1, :])
        h = _layernorm(h, ev[1:2, :], ev[2:3, :])
        h = jnp.maximum(h, 0.0)                       # ReLU (Dropout = id @ eval)
        o_ref[...] = h * xscale + pe_ref[...].astype(jnp.float32)  # x*sqrt(d)+PE

    x = o_ref[...]                                    # resident activation (T, D) f32
    T, D = x.shape
    dh = D // n_heads
    vecs = vec_ref[...]                               # (6, D): n1_g n1_b b_o n2_g n2_b b2

    # ---------------- pre-norm multi-head self-attention ---------------------
    xn = _layernorm(x, vecs[0:1, :], vecs[1:2, :]).astype(jnp.bfloat16)
    # Single (T, 3D) QKV matmul; cast to bf16 ONCE before head reshapes.
    qkv = (jnp.dot(xn, w_qkv_ref[...], preferred_element_type=jnp.float32)
           + b_qkv_ref[...]).astype(jnp.bfloat16)     # (T, 3D)

    def heads(m2d):                                   # (T, D) -> (H, T, dh)
        return jnp.swapaxes(m2d.reshape(T, n_heads, dh), 0, 1)

    qh = heads(qkv[:, :D])
    kh = heads(qkv[:, D:2 * D])
    vh = heads(qkv[:, 2 * D:])

    # Full-context attention (all-ones mask -> masked_fill is identity).
    # 1/sqrt(dh) is pre-folded into W_q/b_q at init -> no score multiply here.
    s = jnp.einsum('htd,hsd->hts', qh, kh,
                   preferred_element_type=jnp.float32)          # (H, T, T) f32
    m = jnp.max(s, axis=-1, keepdims=True)
    e = jnp.exp(s - m)
    # chain exp/normalize/cast so s, e, p are not all live at once
    p = (e * pl.reciprocal(jnp.sum(e, axis=-1, keepdims=True), approx=True)
         ).astype(jnp.bfloat16)                                  # (H, T, T) bf16
    ctx = jnp.einsum('hts,hsd->htd', p, vh,
                     preferred_element_type=jnp.float32)         # (H, T, dh) f32
    # lane-dense head concat -> single full-K output projection on the MXU
    ctx2d = jnp.swapaxes(ctx.astype(jnp.bfloat16), 0, 1).reshape(T, D)
    att = jnp.dot(ctx2d, w_o_ref[...], preferred_element_type=jnp.float32)
    x = x + att + vecs[2:3, :]

    # ---------------- pre-norm position-wise feed-forward --------------------
    xn2 = _layernorm(x, vecs[3:4, :], vecs[4:5, :]).astype(jnp.bfloat16)
    h1 = jnp.maximum(
        jnp.dot(xn2, w1_ref[...], preferred_element_type=jnp.float32)
        + b1_ref[...], 0.0)
    y = (jnp.dot(h1.astype(jnp.bfloat16), w2_ref[...],
                 preferred_element_type=jnp.float32) + vecs[5:6, :])
    x = x + y

    @pl.when(l < n_layers - 1)
    def _():
        o_ref[...] = x

    @pl.when(l == n_layers - 1)                        # fuse after_norm
    def _():
        av = after_vec_ref[...]
        o_ref[...] = _layernorm(x, av[0:1, :], av[1:2, :])


# ----------------------------- wrapper ----------------------------------------

def _vmem_limit_bytes():
    # Generation-aware scoped-VMEM limit: ~75% of physical, capped at 100 MiB
    # (v7x: 64 MiB -> ~48 MiB; v5e/v6e: 128 MiB -> ~96 MiB).
    cap = 128 * 1024 * 1024
    try:
        info = pltpu.get_tpu_info()
        cap = int(getattr(info, "vmem_capacity_bytes", cap))
    except Exception:
        pass
    return int(min(100 * 1024 * 1024, (cap * 3) // 4))


def transformer_forward(x, params, *, n_heads, masks=None):
    # Full-context path only (dynamic-chunk training with full context ->
    # all-ones chunk mask). Padded / chunk-masked batches are not supported.
    assert masks is None, "padded/chunked attention masks not supported by this kernel"

    B, T, Din = x.shape
    D = params['w_emb'].shape[1]
    L, _, F = params['w1'].shape
    dh = D // n_heads

    def shared(shape):
        return pl.BlockSpec(shape, lambda b, l: (0,) * len(shape))

    def per_layer(shape):                              # leading layer dim squeezed
        return pl.BlockSpec((None,) + shape, lambda b, l: (l,) + (0,) * len(shape))

    act_in = pl.BlockSpec((None, T, Din), lambda b, l: (b, 0, 0))
    act_out = pl.BlockSpec((None, T, D), lambda b, l: (b, 0, 0))

    # ---- advisory cost estimate so XLA schedules around the fused call ------
    flops = 2 * B * L * T * D * (3 * D + D + 2 * F)          # QKV + out-proj + FF
    flops += 2 * B * L * 2 * n_heads * T * T * dh            # scores + context
    flops += 2 * B * T * Din * D                             # embed
    transcendentals = B * L * n_heads * T * T                # softmax exp
    weight_bytes = L * (D * 3 * D + D * D + D * F + F * D) * 2   # bf16, per batch step
    bytes_accessed = (B * T * Din * 4 + B * T * D * 4
                      + B * weight_bytes + T * D * 2 + Din * D * 2)
    cost = pl.CostEstimate(flops=int(flops),
                           transcendentals=int(transcendentals),
                           bytes_accessed=int(bytes_accessed))

    return pl.pallas_call(
        functools.partial(_fused_kernel, n_heads=n_heads, xscale=math.sqrt(D)),
        grid=(B, L),
        in_specs=[act_in,
                  shared((Din, D)),       # w_emb
                  shared((3, D)),         # [b_emb, ln_emb_g, ln_emb_b]
                  shared((T, D)),         # pe (bf16)
                  shared((2, D)),         # [after_g, after_b]
                  per_layer((D, 3 * D)),  # w_qkv  (W_q pre-scaled by 1/sqrt(dh))
                  per_layer((1, 3 * D)),  # b_qkv
                  per_layer((D, D)),      # w_o    (single fused matmul)
                  per_layer((D, F)),      # w1
                  per_layer((1, F)),      # b1
                  per_layer((F, D)),      # w2
                  per_layer((6, D))],     # [n1_g, n1_b, b_o, n2_g, n2_b, b2]
        out_specs=act_out,
        out_shape=jax.ShapeDtypeStruct((B, T, D), jnp.float32),
        cost_estimate=cost,
        compiler_params=pltpu.CompilerParams(
            dimension_semantics=("parallel", "arbitrary"),
            vmem_limit_bytes=_vmem_limit_bytes()),
    )(x, params['w_emb'], params['emb_vec'], params['pe'], params['after_vec'],
      params['w_qkv'], params['b_qkv'], params['w_o'],
      params['w1'], params['b1'], params['w2'], params['vecs'])


# ----------------------------- params ------------------------------------------

def make_positional_encoding(T, D):
    pos = jnp.arange(T, dtype=jnp.float32)[:, None]
    div = jnp.exp(jnp.arange(0, D, 2, dtype=jnp.float32) * -(math.log(10000.0) / D))
    pe = jnp.zeros((T, D), jnp.float32)
    pe = pe.at[:, 0::2].set(jnp.sin(pos * div))
    pe = pe.at[:, 1::2].set(jnp.cos(pos * div))
    return pe


def init_params(key, *, input_dim, attn_dim, ff_dim, n_blocks, n_heads, seq_len):
    dh = attn_dim // n_heads
    inv_sqrt_dh = 1.0 / math.sqrt(dh)
    keys = iter(jax.random.split(key, 1 + 6 * n_blocks))

    def w(shape, scale=0.05):
        # weights stored (in, out) in bf16 — kernel computes x @ W + b on the MXU
        return (scale * jax.random.normal(next(keys), shape)).astype(jnp.bfloat16)

    zeros = lambda s: jnp.zeros(s, jnp.float32)
    ones = lambda s: jnp.ones(s, jnp.float32)

    def qkv_weight():
        # 1/sqrt(dh) folded into W_q (and b_q would need the same scaling if nonzero)
        wq = w((attn_dim, attn_dim)) * inv_sqrt_dh
        wk = w((attn_dim, attn_dim))
        wv = w((attn_dim, attn_dim))
        return jnp.concatenate([wq, wk, wv], axis=1)

    params = {
        'w_emb': w((input_dim, attn_dim)),
        'emb_vec': jnp.concatenate(                     # [b_emb, ln_g, ln_b]
            [zeros((1, attn_dim)), ones((1, attn_dim)), zeros((1, attn_dim))], 0),
        'after_vec': jnp.concatenate(                   # [after_g, after_b]
            [ones((1, attn_dim)), zeros((1, attn_dim))], 0),
        'pe': make_positional_encoding(seq_len, attn_dim).astype(jnp.bfloat16),
        # stacked per-layer weights
        'w_qkv': jnp.stack([qkv_weight() for _ in range(n_blocks)]),
        'b_qkv': zeros((n_blocks, 1, 3 * attn_dim)),    # zero biases (demo)
        'w_o': jnp.stack([w((attn_dim, attn_dim)) for _ in range(n_blocks)]),
        'w1': jnp.stack([w((attn_dim, ff_dim)) for _ in range(n_blocks)]),
        'b1': zeros((n_blocks, 1, ff_dim)),
        'w2': jnp.stack([w((ff_dim, attn_dim)) for _ in range(n_blocks)]),
        # [n1_g, n1_b, b_o, n2_g, n2_b, b2] per layer
        'vecs': jnp.tile(
            jnp.concatenate([ones((1, attn_dim)), zeros((1, attn_dim)),
                             zeros((1, attn_dim)), ones((1, attn_dim)),
                             zeros((1, attn_dim)), zeros((1, attn_dim))], 0)[None],
            (n_blocks, 1, 1)),
    }
    return params


# ----------------------------- main ---------------------------------------------

if __name__ == "__main__":
    # Small, lane-friendly config consistent with the module defaults
    # (256 attn dim / 4 heads / 1024 ff / 6 blocks, scaled down for the demo).
    B, T = 2, 16
    INPUT_DIM, ATTN_DIM, HEADS, FF_DIM, BLOCKS = 64, 128, 4, 256, 2

    key = jax.random.PRNGKey(0)
    kx, kp = jax.random.split(key)
    x = jax.random.normal(kx, (B, T, INPUT_DIM), dtype=jnp.float32)
    params = init_params(kp, input_dim=INPUT_DIM, attn_dim=ATTN_DIM,
                         ff_dim=FF_DIM, n_blocks=BLOCKS, n_heads=HEADS,
                         seq_len=T)

    out = transformer_forward(x, params, n_heads=HEADS)
    out = jax.block_until_ready(out)
    assert out.shape == (B, T, ATTN_DIM)
    assert bool(jnp.all(jnp.isfinite(out)))
    print("KERNEL_OK")
</pallas_src>

<mosaic_0001>
module attributes {stable_mosaic.version = 11 : i64} {
  func.func @_fused_kernel(%arg0: i32, %arg1: i32, %arg2: memref<1x16x64xf32, #tpu.memory_space<vmem>>, %arg3: memref<64x128xbf16, #tpu.memory_space<vmem>>, %arg4: memref<3x128xf32, #tpu.memory_space<vmem>>, %arg5: memref<16x128xbf16, #tpu.memory_space<vmem>>, %arg6: memref<2x128xf32, #tpu.memory_space<vmem>>, %arg7: memref<1x128x384xbf16, #tpu.memory_space<vmem>>, %arg8: memref<1x1x384xf32, #tpu.memory_space<vmem>>, %arg9: memref<1x128x128xbf16, #tpu.memory_space<vmem>>, %arg10: memref<1x128x256xbf16, #tpu.memory_space<vmem>>, %arg11: memref<1x1x256xf32, #tpu.memory_space<vmem>>, %arg12: memref<1x256x128xbf16, #tpu.memory_space<vmem>>, %arg13: memref<1x6x128xf32, #tpu.memory_space<vmem>>, %arg14: memref<1x16x128xf32, #tpu.memory_space<vmem>>) attributes {dimension_semantics = [#tpu.dimension_semantics<parallel>, #tpu.dimension_semantics<arbitrary>], iteration_bounds = array<i64: 2, 2>, scalar_prefetch = 0 : i64, scratch_operands = 0 : i64, tpu.core_type = #tpu.core_type<tc>, window_params = [{transform_indices = @transform_0, window_bounds = array<i64: 1, 16, 64>}, {pipeline_mode = #tpu.pipeline_mode<synchronous>, transform_indices = @transform_1, window_bounds = array<i64: 64, 128>}, {pipeline_mode = #tpu.pipeline_mode<synchronous>, transform_indices = @transform_2, window_bounds = array<i64: 3, 128>}, {pipeline_mode = #tpu.pipeline_mode<synchronous>, transform_indices = @transform_3, window_bounds = array<i64: 16, 128>}, {pipeline_mode = #tpu.pipeline_mode<synchronous>, transform_indices = @transform_4, window_bounds = array<i64: 2, 128>}, {transform_indices = @transform_5, window_bounds = array<i64: 1, 128, 384>}, {transform_indices = @transform_6, window_bounds = array<i64: 1, 1, 384>}, {transform_indices = @transform_7, window_bounds = array<i64: 1, 128, 128>}, {transform_indices = @transform_8, window_bounds = array<i64: 1, 128, 256>}, {transform_indices = @transform_9, window_bounds = array<i64: 1, 1, 256>}, {transform_indices = @transform_10, window_bounds = array<i64: 1, 256, 128>}, {transform_indices = @transform_11, window_bounds = array<i64: 1, 6, 128>}, {transform_indices = @transform_12, window_bounds = array<i64: 1, 16, 128>}]} {
    %c0_i32 = arith.constant 0 : i32
    %0 = arith.cmpi eq, %arg1, %c0_i32 : i32
    %1 = arith.extui %0 : i1 to i32
    %c0_i32_0 = arith.constant 0 : i32
    %2 = arith.cmpi ne, %1, %c0_i32_0 : i32
    scf.if %2 {
      %c0_45 = arith.constant 0 : index
      %c0_46 = arith.constant 0 : index
      %120 = vector.load %arg4[%c0_45, %c0_46] : memref<3x128xf32, #tpu.memory_space<vmem>>, vector<3x128xf32>
      %c0_47 = arith.constant 0 : index
      %c0_48 = arith.constant 0 : index
      %c0_49 = arith.constant 0 : index
      %121 = vector.load %arg2[%c0_47, %c0_48, %c0_49] : memref<1x16x64xf32, #tpu.memory_space<vmem>>, vector<1x16x64xf32>
      %122 = vector.shape_cast %121 : vector<1x16x64xf32> to vector<16x64xf32>
      %123 = arith.truncf %122 : vector<16x64xf32> to vector<16x64xbf16>
      %c0_50 = arith.constant 0 : index
      %c0_51 = arith.constant 0 : index
      %124 = vector.load %arg3[%c0_50, %c0_51] : memref<64x128xbf16, #tpu.memory_space<vmem>>, vector<64x128xbf16>
      %cst_52 = arith.constant dense<0.000000e+00> : vector<16x128xf32>
      %125 = tpu.matmul %123, %124, %cst_52 {dimension_numbers = #tpu.dot_dimension_numbers<[1], [0], [0], [1], [0, 0, 1, 1], [], []>} : vector<16x64xbf16>, vector<64x128xbf16>, vector<16x128xf32> -> vector<16x128xf32>
      %126 = vector.extract_strided_slice %120 {offsets = [0, 0], sizes = [1, 128], strides = [1, 1]} : vector<3x128xf32> to vector<1x128xf32>
      %127 = vector.broadcast %126 : vector<1x128xf32> to vector<16x128xf32>
      %128 = arith.addf %125, %127 : vector<16x128xf32>
      %129 = vector.extract_strided_slice %120 {offsets = [1, 0], sizes = [1, 128], strides = [1, 1]} : vector<3x128xf32> to vector<1x128xf32>
      %130 = vector.extract_strided_slice %120 {offsets = [2, 0], sizes = [1, 128], strides = [1, 1]} : vector<3x128xf32> to vector<1x128xf32>
      %cst_53 = arith.constant dense<0.000000e+00> : vector<16xf32>
      %131 = vector.multi_reduction <add>, %128, %cst_53 [1] : vector<16x128xf32> to vector<16xf32>
      %132 = vector.shape_cast %131 : vector<16xf32> to vector<16x1xf32>
      %cst_54 = arith.constant 1.280000e+02 : f32
      %133 = vector.broadcast %cst_54 : f32 to vector<16x1xf32>
      %134 = arith.divf %132, %133 : vector<16x1xf32>
      %135 = vector.broadcast %134 : vector<16x1xf32> to vector<16x128xf32>
      %136 = arith.subf %128, %135 : vector<16x128xf32>
      %137 = arith.mulf %136, %136 : vector<16x128xf32>
      %cst_55 = arith.constant dense<0.000000e+00> : vector<16xf32>
      %138 = vector.multi_reduction <add>, %137, %cst_55 [1] : vector<16x128xf32> to vector<16xf32>
      %139 = vector.shape_cast %138 : vector<16xf32> to vector<16x1xf32>
      %cst_56 = arith.constant 1.280000e+02 : f32
      %140 = vector.broadcast %cst_56 : f32 to vector<16x1xf32>
      %141 = arith.divf %139, %140 : vector<16x1xf32>
      %142 = vector.broadcast %134 : vector<16x1xf32> to vector<16x128xf32>
      %143 = arith.subf %128, %142 : vector<16x128xf32>
      %cst_57 = arith.constant 9.99999974E-6 : f32
      %144 = vector.broadcast %cst_57 : f32 to vector<16x1xf32>
      %145 = arith.addf %141, %144 : vector<16x1xf32>
      %146 = math.rsqrt %145 : vector<16x1xf32>
      %147 = vector.broadcast %146 : vector<16x1xf32> to vector<16x128xf32>
      %148 = arith.mulf %143, %147 : vector<16x128xf32>
      %149 = vector.broadcast %129 : vector<1x128xf32> to vector<16x128xf32>
      %150 = arith.mulf %148, %149 : vector<16x128xf32>
      %151 = vector.broadcast %130 : vector<1x128xf32> to vector<16x128xf32>
      %152 = arith.addf %150, %151 : vector<16x128xf32>
      %cst_58 = arith.constant 0.000000e+00 : f32
      %153 = vector.broadcast %cst_58 : f32 to vector<16x128xf32>
      %154 = arith.maximumf %152, %153 : vector<16x128xf32>
      %cst_59 = arith.constant 11.3137083 : f32
      %155 = vector.broadcast %cst_59 : f32 to vector<16x128xf32>
      %156 = arith.mulf %154, %155 : vector<16x128xf32>
      %c0_60 = arith.constant 0 : index
      %c0_61 = arith.constant 0 : index
      %157 = vector.load %arg5[%c0_60, %c0_61] : memref<16x128xbf16, #tpu.memory_space<vmem>>, vector<16x128xbf16>
      %158 = arith.extf %157 : vector<16x128xbf16> to vector<16x128xf32>
      %159 = arith.addf %156, %158 : vector<16x128xf32>
      %c0_62 = arith.constant 0 : index
      %c0_63 = arith.constant 0 : index
      %c0_64 = arith.constant 0 : index
      %160 = vector.load %arg14[%c0_62, %c0_63, %c0_64] : memref<1x16x128xf32, #tpu.memory_space<vmem>>, vector<1x16x128xf32>
      %161 = vector.shape_cast %160 : vector<1x16x128xf32> to vector<16x128xf32>
      %162 = vector.shape_cast %159 : vector<16x128xf32> to vector<1x16x128xf32>
      tpu.vector_store %arg14[%c0_62, %c0_63, %c0_64], %162 {strides = array<i32>} : memref<1x16x128xf32, #tpu.memory_space<vmem>>, vector<1x16x128xf32>,
    } else {
    }
    %c0 = arith.constant 0 : index
    %c0_1 = arith.constant 0 : index
    %c0_2 = arith.constant 0 : index
    %3 = vector.load %arg14[%c0, %c0_1, %c0_2] : memref<1x16x128xf32, #tpu.memory_space<vmem>>, vector<1x16x128xf32>
    %4 = vector.shape_cast %3 : vector<1x16x128xf32> to vector<16x128xf32>
    %c0_3 = arith.constant 0 : index
    %c0_4 = arith.constant 0 : index
    %c0_5 = arith.constant 0 : index
    %5 = vector.load %arg13[%c0_3, %c0_4, %c0_5] : memref<1x6x128xf32, #tpu.memory_space<vmem>>, vector<1x6x128xf32>
    %6 = vector.shape_cast %5 : vector<1x6x128xf32> to vector<6x128xf32>
    %7 = vector.extract_strided_slice %6 {offsets = [0, 0], sizes = [1, 128], strides = [1, 1]} : vector<6x128xf32> to vector<1x128xf32>
    %8 = vector.extract_strided_slice %6 {offsets = [1, 0], sizes = [1, 128], strides = [1, 1]} : vector<6x128xf32> to vector<1x128xf32>
    %cst = arith.constant dense<0.000000e+00> : vector<16xf32>
    %9 = vector.multi_reduction <add>, %4, %cst [1] : vector<16x128xf32> to vector<16xf32>
    %10 = vector.shape_cast %9 : vector<16xf32> to vector<16x1xf32>
    %cst_6 = arith.constant 1.280000e+02 : f32
    %11 = vector.broadcast %cst_6 : f32 to vector<16x1xf32>
    %12 = arith.divf %10, %11 : vector<16x1xf32>
    %13 = vector.broadcast %12 : vector<16x1xf32> to vector<16x128xf32>
    %14 = arith.subf %4, %13 : vector<16x128xf32>
    %15 = arith.mulf %14, %14 : vector<16x128xf32>
    %cst_7 = arith.constant dense<0.000000e+00> : vector<16xf32>
    %16 = vector.multi_reduction <add>, %15, %cst_7 [1] : vector<16x128xf32> to vector<16xf32>
    %17 = vector.shape_cast %16 : vector<16xf32> to vector<16x1xf32>
    %cst_8 = arith.constant 1.280000e+02 : f32
    %18 = vector.broadcast %cst_8 : f32 to vector<16x1xf32>
    %19 = arith.divf %17, %18 : vector<16x1xf32>
    %20 = vector.broadcast %12 : vector<16x1xf32> to vector<16x128xf32>
    %21 = arith.subf %4, %20 : vector<16x128xf32>
    %cst_9 = arith.constant 9.99999974E-6 : f32
    %22 = vector.broadcast %cst_9 : f32 to vector<16x1xf32>
    %23 = arith.addf %19, %22 : vector<16x1xf32>
    %24 = math.rsqrt %23 : vector<16x1xf32>
    %25 = vector.broadcast %24 : vector<16x1xf32> to vector<16x128xf32>
    %26 = arith.mulf %21, %25 : vector<16x128xf32>
    %27 = vector.broadcast %7 : vector<1x128xf32> to vector<16x128xf32>
    %28 = arith.mulf %26, %27 : vector<16x128xf32>
    %29 = vector.broadcast %8 : vector<1x128xf32> to vector<16x128xf32>
    %30 = arith.addf %28, %29 : vector<16x128xf32>
    %31 = arith.truncf %30 : vector<16x128xf32> to vector<16x128xbf16>
    %c0_10 = arith.constant 0 : index
    %c0_11 = arith.constant 0 : index
    %c0_12 = arith.constant 0 : index
    %32 = vector.load %arg7[%c0_10, %c0_11, %c0_12] : memref<1x128x384xbf16, #tpu.memory_space<vmem>>, vector<1x128x384xbf16>
    %33 = vector.shape_cast %32 : vector<1x128x384xbf16> to vector<128x384xbf16>
    %cst_13 = arith.constant dense<0.000000e+00> : vector<16x384xf32>
    %34 = tpu.matmul %31, %33, %cst_13 {dimension_numbers = #tpu.dot_dimension_numbers<[1], [0], [0], [1], [0, 0, 1, 1], [], []>} : vector<16x128xbf16>, vector<128x384xbf16>, vector<16x384xf32> -> vector<16x384xf32>
    %c0_14 = arith.constant 0 : index
    %c0_15 = arith.constant 0 : index
    %c0_16 = arith.constant 0 : index
    %35 = vector.load %arg8[%c0_14, %c0_15, %c0_16] : memref<1x1x384xf32, #tpu.memory_space<vmem>>, vector<1x1x384xf32>
    %36 = vector.shape_cast %35 : vector<1x1x384xf32> to vector<1x384xf32>
    %37 = vector.broadcast %36 : vector<1x384xf32> to vector<16x384xf32>
    %38 = arith.addf %34, %37 : vector<16x384xf32>
    %39 = arith.truncf %38 : vector<16x384xf32> to vector<16x384xbf16>
    %40 = vector.extract_strided_slice %39 {offsets = [0, 0], sizes = [16, 128], strides = [1, 1]} : vector<16x384xbf16> to vector<16x128xbf16>
    %41 = vector.shape_cast %40 : vector<16x128xbf16> to vector<16x4x32xbf16>
    %42 = tpu.transpose %41, [1, 0, 2] : vector<16x4x32xbf16> -> vector<4x16x32xbf16>
    %43 = vector.extract_strided_slice %39 {offsets = [0, 128], sizes = [16, 128], strides = [1, 1]} : vector<16x384xbf16> to vector<16x128xbf16>
    %44 = vector.shape_cast %43 : vector<16x128xbf16> to vector<16x4x32xbf16>
    %45 = tpu.transpose %44, [1, 0, 2] : vector<16x4x32xbf16> -> vector<4x16x32xbf16>
    %46 = vector.extract_strided_slice %39 {offsets = [0, 256], sizes = [16, 128], strides = [1, 1]} : vector<16x384xbf16> to vector<16x128xbf16>
    %47 = vector.shape_cast %46 : vector<16x128xbf16> to vector<16x4x32xbf16>
    %48 = tpu.transpose %47, [1, 0, 2] : vector<16x4x32xbf16> -> vector<4x16x32xbf16>
    "tpu.trace_start"() <{level = 10 : i32, message = "htd,hsd->hts"}> : () -> ()
    %cst_17 = arith.constant dense<0.000000e+00> : vector<4x16x16xf32>
    %49 = tpu.matmul %42, %45, %cst_17 {dimension_numbers = #tpu.dot_dimension_numbers<[2], [2], [1], [1], [0, 0, 0, 1, 1, 1], [0], [0]>} : vector<4x16x32xbf16>, vector<4x16x32xbf16>, vector<4x16x16xf32> -> vector<4x16x16xf32>
    "tpu.trace_stop"() : () -> ()
    %cst_18 = arith.constant dense<0xFF800000> : vector<4x16xf32>
    %50 = vector.multi_reduction <maximumf>, %49, %cst_18 [2] : vector<4x16x16xf32> to vector<4x16xf32>
    %51 = vector.shape_cast %50 : vector<4x16xf32> to vector<4x16x1xf32>
    %52 = vector.broadcast %51 : vector<4x16x1xf32> to vector<4x16x16xf32>
    %53 = arith.subf %49, %52 : vector<4x16x16xf32>
    %54 = math.exp %53 : vector<4x16x16xf32>
    %cst_19 = arith.constant dense<0.000000e+00> : vector<4x16xf32>
    %55 = vector.multi_reduction <add>, %54, %cst_19 [2] : vector<4x16x16xf32> to vector<4x16xf32>
    %56 = vector.shape_cast %55 : vector<4x16xf32> to vector<4x16x1xf32>
    %57 = tpu.reciprocal %56 {approx = true} : vector<4x16x1xf32> -> vector<4x16x1xf32>
    %58 = vector.broadcast %57 : vector<4x16x1xf32> to vector<4x16x16xf32>
    %59 = arith.mulf %54, %58 : vector<4x16x16xf32>
    %60 = arith.truncf %59 : vector<4x16x16xf32> to vector<4x16x16xbf16>
    "tpu.trace_start"() <{level = 10 : i32, message = "hts,hsd->htd"}> : () -> ()
    %cst_20 = arith.constant dense<0.000000e+00> : vector<4x16x32xf32>
    %61 = tpu.matmul %60, %48, %cst_20 {dimension_numbers = #tpu.dot_dimension_numbers<[2], [1], [1], [2], [0, 0, 0, 1, 1, 2], [0], [0]>} : vector<4x16x16xbf16>, vector<4x16x32xbf16>, vector<4x16x32xf32> -> vector<4x16x32xf32>
    "tpu.trace_stop"() : () -> ()
    %62 = arith.truncf %61 : vector<4x16x32xf32> to vector<4x16x32xbf16>
    %63 = tpu.transpose %62, [1, 0, 2] : vector<4x16x32xbf16> -> vector<16x4x32xbf16>
    %64 = vector.shape_cast %63 : vector<16x4x32xbf16> to vector<16x128xbf16>
    %c0_21 = arith.constant 0 : index
    %c0_22 = arith.constant 0 : index
    %c0_23 = arith.constant 0 : index
    %65 = vector.load %arg9[%c0_21, %c0_22, %c0_23] : memref<1x128x128xbf16, #tpu.memory_space<vmem>>, vector<1x128x128xbf16>
    %66 = vector.shape_cast %65 : vector<1x128x128xbf16> to vector<128x128xbf16>
    %cst_24 = arith.constant dense<0.000000e+00> : vector<16x128xf32>
    %67 = tpu.matmul %64, %66, %cst_24 {dimension_numbers = #tpu.dot_dimension_numbers<[1], [0], [0], [1], [0, 0, 1, 1], [], []>} : vector<16x128xbf16>, vector<128x128xbf16>, vector<16x128xf32> -> vector<16x128xf32>
    %68 = arith.addf %4, %67 : vector<16x128xf32>
    %69 = vector.extract_strided_slice %6 {offsets = [2, 0], sizes = [1, 128], strides = [1, 1]} : vector<6x128xf32> to vector<1x128xf32>
    %70 = vector.broadcast %69 : vector<1x128xf32> to vector<16x128xf32>
    %71 = arith.addf %68, %70 : vector<16x128xf32>
    %72 = vector.extract_strided_slice %6 {offsets = [3, 0], sizes = [1, 128], strides = [1, 1]} : vector<6x128xf32> to vector<1x128xf32>
    %73 = vector.extract_strided_slice %6 {offsets = [4, 0], sizes = [1, 128], strides = [1, 1]} : vector<6x128xf32> to vector<1x128xf32>
    %cst_25 = arith.constant dense<0.000000e+00> : vector<16xf32>
    %74 = vector.multi_reduction <add>, %71, %cst_25 [1] : vector<16x128xf32> to vector<16xf32>
    %75 = vector.shape_cast %74 : vector<16xf32> to vector<16x1xf32>
    %cst_26 = arith.constant 1.280000e+02 : f32
    %76 = vector.broadcast %cst_26 : f32 to vector<16x1xf32>
    %77 = arith.divf %75, %76 : vector<16x1xf32>
    %78 = vector.broadcast %77 : vector<16x1xf32> to vector<16x128xf32>
    %79 = arith.subf %71, %78 : vector<16x128xf32>
    %80 = arith.mulf %79, %79 : vector<16x128xf32>
    %cst_27 = arith.constant dense<0.000000e+00> : vector<16xf32>
    %81 = vector.multi_reduction <add>, %80, %cst_27 [1] : vector<16x128xf32> to vector<16xf32>
    %82 = vector.shape_cast %81 : vector<16xf32> to vector<16x1xf32>
    %cst_28 = arith.constant 1.280000e+02 : f32
    %83 = vector.broadcast %cst_28 : f32 to vector<16x1xf32>
    %84 = arith.divf %82, %83 : vector<16x1xf32>
    %85 = vector.broadcast %77 : vector<16x1xf32> to vector<16x128xf32>
    %86 = arith.subf %71, %85 : vector<16x128xf32>
    %cst_29 = arith.constant 9.99999974E-6 : f32
    %87 = vector.broadcast %cst_29 : f32 to vector<16x1xf32>
    %88 = arith.addf %84, %87 : vector<16x1xf32>
    %89 = math.rsqrt %88 : vector<16x1xf32>
    %90 = vector.broadcast %89 : vector<16x1xf32> to vector<16x128xf32>
    %91 = arith.mulf %86, %90 : vector<16x128xf32>
    %92 = vector.broadcast %72 : vector<1x128xf32> to vector<16x128xf32>
    %93 = arith.mulf %91, %92 : vector<16x128xf32>
    %94 = vector.broadcast %73 : vector<1x128xf32> to vector<16x128xf32>
    %95 = arith.addf %93, %94 : vector<16x128xf32>
    %96 = arith.truncf %95 : vector<16x128xf32> to vector<16x128xbf16>
    %c0_30 = arith.constant 0 : index
    %c0_31 = arith.constant 0 : index
    %c0_32 = arith.constant 0 : index
    %97 = vector.load %arg10[%c0_30, %c0_31, %c0_32] : memref<1x128x256xbf16, #tpu.memory_space<vmem>>, vector<1x128x256xbf16>
    %98 = vector.shape_cast %97 : vector<1x128x256xbf16> to vector<128x256xbf16>
    %cst_33 = arith.constant dense<0.000000e+00> : vector<16x256xf32>
    %99 = tpu.matmul %96, %98, %cst_33 {dimension_numbers = #tpu.dot_dimension_numbers<[1], [0], [0], [1], [0, 0, 1, 1], [], []>} : vector<16x128xbf16>, vector<128x256xbf16>, vector<16x256xf32> -> vector<16x256xf32>
    %c0_34 = arith.constant 0 : index
    %c0_35 = arith.constant 0 : index
    %c0_36 = arith.constant 0 : index
    %100 = vector.load %arg11[%c0_34, %c0_35, %c0_36] : memref<1x1x256xf32, #tpu.memory_space<vmem>>, vector<1x1x256xf32>
    %101 = vector.shape_cast %100 : vector<1x1x256xf32> to vector<1x256xf32>
    %102 = vector.broadcast %101 : vector<1x256xf32> to vector<16x256xf32>
    %103 = arith.addf %99, %102 : vector<16x256xf32>
    %cst_37 = arith.constant 0.000000e+00 : f32
    %104 = vector.broadcast %cst_37 : f32 to vector<16x256xf32>
    %105 = arith.maximumf %103, %104 : vector<16x256xf32>
    %106 = arith.truncf %105 : vector<16x256xf32> to vector<16x256xbf16>
    %c0_38 = arith.constant 0 : index
    %c0_39 = arith.constant 0 : index
    %c0_40 = arith.constant 0 : index
    %107 = vector.load %arg12[%c0_38, %c0_39, %c0_40] : memref<1x256x128xbf16, #tpu.memory_space<vmem>>, vector<1x256x128xbf16>
    %108 = vector.shape_cast %107 : vector<1x256x128xbf16> to vector<256x128xbf16>
    %cst_41 = arith.constant dense<0.000000e+00> : vector<16x128xf32>
    %109 = tpu.matmul %106, %108, %cst_41 {dimension_numbers = #tpu.dot_dimension_numbers<[1], [0], [0], [1], [0, 0, 1, 1], [], []>} : vector<16x256xbf16>, vector<256x128xbf16>, vector<16x128xf32> -> vector<16x128xf32>
    %110 = vector.extract_strided_slice %6 {offsets = [5, 0], sizes = [1, 128], strides = [1, 1]} : vector<6x128xf32> to vector<1x128xf32>
    %111 = vector.broadcast %110 : vector<1x128xf32> to vector<16x128xf32>
    %112 = arith.addf %109, %111 : vector<16x128xf32>
    %113 = arith.addf %71, %112 : vector<16x128xf32>
    %c1_i32 = arith.constant 1 : i32
    %114 = arith.cmpi slt, %arg1, %c1_i32 : i32
    %115 = arith.extui %114 : i1 to i32
    %c0_i32_42 = arith.constant 0 : i32
    %116 = arith.cmpi ne, %115, %c0_i32_42 : i32
    scf.if %116 {
      %c0_45 = arith.constant 0 : index
      %c0_46 = arith.constant 0 : index
      %c0_47 = arith.constant 0 : index
      %120 = vector.load %arg14[%c0_45, %c0_46, %c0_47] : memref<1x16x128xf32, #tpu.memory_space<vmem>>, vector<1x16x128xf32>
      %121 = vector.shape_cast %120 : vector<1x16x128xf32> to vector<16x128xf32>
      %122 = vector.shape_cast %113 : vector<16x128xf32> to vector<1x16x128xf32>
      tpu.vector_store %arg14[%c0_45, %c0_46, %c0_47], %122 {strides = array<i32>} : memref<1x16x128xf32, #tpu.memory_space<vmem>>, vector<1x16x128xf32>,
    } else {
    }
    %c1_i32_43 = arith.constant 1 : i32
    %117 = arith.cmpi eq, %arg1, %c1_i32_43 : i32
    %118 = arith.extui %117 : i1 to i32
    %c0_i32_44 = arith.constant 0 : i32
    %119 = arith.cmpi ne, %118, %c0_i32_44 : i32
    scf.if %119 {
      %c0_45 = arith.constant 0 : index
      %c0_46 = arith.constant 0 : index
      %120 = vector.load %arg6[%c0_45, %c0_46] : memref<2x128xf32, #tpu.memory_space<vmem>>, vector<2x128xf32>
      %121 = vector.extract_strided_slice %120 {offsets = [0, 0], sizes = [1, 128], strides = [1, 1]} : vector<2x128xf32> to vector<1x128xf32>
      %122 = vector.extract_strided_slice %120 {offsets = [1, 0], sizes = [1, 128], strides = [1, 1]} : vector<2x128xf32> to vector<1x128xf32>
      %cst_47 = arith.constant dense<0.000000e+00> : vector<16xf32>
      %123 = vector.multi_reduction <add>, %113, %cst_47 [1] : vector<16x128xf32> to vector<16xf32>
      %124 = vector.shape_cast %123 : vector<16xf32> to vector<16x1xf32>
      %cst_48 = arith.constant 1.280000e+02 : f32
      %125 = vector.broadcast %cst_48 : f32 to vector<16x1xf32>
      %126 = arith.divf %124, %125 : vector<16x1xf32>
      %127 = vector.broadcast %126 : vector<16x1xf32> to vector<16x128xf32>
      %128 = arith.subf %113, %127 : vector<16x128xf32>
      %129 = arith.mulf %128, %128 : vector<16x128xf32>
      %cst_49 = arith.constant dense<0.000000e+00> : vector<16xf32>
      %130 = vector.multi_reduction <add>, %129, %cst_49 [1] : vector<16x128xf32> to vector<16xf32>
      %131 = vector.shape_cast %130 : vector<16xf32> to vector<16x1xf32>
      %cst_50 = arith.constant 1.280000e+02 : f32
      %132 = vector.broadcast %cst_50 : f32 to vector<16x1xf32>
      %133 = arith.divf %131, %132 : vector<16x1xf32>
      %134 = vector.broadcast %126 : vector<16x1xf32> to vector<16x128xf32>
      %135 = arith.subf %113, %134 : vector<16x128xf32>
      %cst_51 = arith.constant 9.99999974E-6 : f32
      %136 = vector.broadcast %cst_51 : f32 to vector<16x1xf32>
      %137 = arith.addf %133, %136 : vector<16x1xf32>
      %138 = math.rsqrt %137 : vector<16x1xf32>
      %139 = vector.broadcast %138 : vector<16x1xf32> to vector<16x128xf32>
      %140 = arith.mulf %135, %139 : vector<16x128xf32>
      %141 = vector.broadcast %121 : vector<1x128xf32> to vector<16x128xf32>
      %142 = arith.mulf %140, %141 : vector<16x128xf32>
      %143 = vector.broadcast %122 : vector<1x128xf32> to vector<16x128xf32>
      %144 = arith.addf %142, %143 : vector<16x128xf32>
      %c0_52 = arith.constant 0 : index
      %c0_53 = arith.constant 0 : index
      %c0_54 = arith.constant 0 : index
      %145 = vector.load %arg14[%c0_52, %c0_53, %c0_54] : memref<1x16x128xf32, #tpu.memory_space<vmem>>, vector<1x16x128xf32>
      %146 = vector.shape_cast %145 : vector<1x16x128xf32> to vector<16x128xf32>
      %147 = vector.shape_cast %144 : vector<16x128xf32> to vector<1x16x128xf32>
      tpu.vector_store %arg14[%c0_52, %c0_53, %c0_54], %147 {strides = array<i32>} : memref<1x16x128xf32, #tpu.memory_space<vmem>>, vector<1x16x128xf32>,
    } else {
    }
    return
  }
  func.func @transform_0(%arg0: i32, %arg1: i32) -> (i32, i32, i32) {
    %c0_i32 = arith.constant 0 : i32
    %c0_i32_0 = arith.constant 0 : i32
    %c0_i32_1 = arith.constant 0 : i32
    return %arg0, %c0_i32, %c0_i32_0 : i32, i32, i32
  }
  func.func @transform_1(%arg0: i32, %arg1: i32) -> (i32, i32) {
    %c0_i32 = arith.constant 0 : i32
    %c0_i32_0 = arith.constant 0 : i32
    %c0_i32_1 = arith.constant 0 : i32
    return %c0_i32, %c0_i32_0 : i32, i32
  }
  func.func @transform_2(%arg0: i32, %arg1: i32) -> (i32, i32) {
    %c0_i32 = arith.constant 0 : i32
    %c0_i32_0 = arith.constant 0 : i32
    %c0_i32_1 = arith.constant 0 : i32
    return %c0_i32, %c0_i32_0 : i32, i32
  }
  func.func @transform_3(%arg0: i32, %arg1: i32) -> (i32, i32) {
    %c0_i32 = arith.constant 0 : i32
    %c0_i32_0 = arith.constant 0 : i32
    %c0_i32_1 = arith.constant 0 : i32
    return %c0_i32, %c0_i32_0 : i32, i32
  }
  func.func @transform_4(%arg0: i32, %arg1: i32) -> (i32, i32) {
    %c0_i32 = arith.constant 0 : i32
    %c0_i32_0 = arith.constant 0 : i32
    %c0_i32_1 = arith.constant 0 : i32
    return %c0_i32, %c0_i32_0 : i32, i32
  }
  func.func @transform_5(%arg0: i32, %arg1: i32) -> (i32, i32, i32) {
    %c0_i32 = arith.constant 0 : i32
    %c0_i32_0 = arith.constant 0 : i32
    %c0_i32_1 = arith.constant 0 : i32
    return %arg1, %c0_i32, %c0_i32_0 : i32, i32, i32
  }
  func.func @transform_6(%arg0: i32, %arg1: i32) -> (i32, i32, i32) {
    %c0_i32 = arith.constant 0 : i32
    %c0_i32_0 = arith.constant 0 : i32
    %c0_i32_1 = arith.constant 0 : i32
    return %arg1, %c0_i32, %c0_i32_0 : i32, i32, i32
  }
  func.func @transform_7(%arg0: i32, %arg1: i32) -> (i32, i32, i32) {
    %c0_i32 = arith.constant 0 : i32
    %c0_i32_0 = arith.constant 0 : i32
    %c0_i32_1 = arith.constant 0 : i32
    return %arg1, %c0_i32, %c0_i32_0 : i32, i32, i32
  }
  func.func @transform_8(%arg0: i32, %arg1: i32) -> (i32, i32, i32) {
    %c0_i32 = arith.constant 0 : i32
    %c0_i32_0 = arith.constant 0 : i32
    %c0_i32_1 = arith.constant 0 : i32
    return %arg1, %c0_i32, %c0_i32_0 : i32, i32, i32
  }
  func.func @transform_9(%arg0: i32, %arg1: i32) -> (i32, i32, i32) {
    %c0_i32 = arith.constant 0 : i32
    %c0_i32_0 = arith.constant 0 : i32
    %c0_i32_1 = arith.constant 0 : i32
    return %arg1, %c0_i32, %c0_i32_0 : i32, i32, i32
  }
  func.func @transform_10(%arg0: i32, %arg1: i32) -> (i32, i32, i32) {
    %c0_i32 = arith.constant 0 : i32
    %c0_i32_0 = arith.constant 0 : i32
    %c0_i32_1 = arith.constant 0 : i32
    return %arg1, %c0_i32, %c0_i32_0 : i32, i32, i32
  }
  func.func @transform_11(%arg0: i32, %arg1: i32) -> (i32, i32, i32) {
    %c0_i32 = arith.constant 0 : i32
    %c0_i32_0 = arith.constant 0 : i32
    %c0_i32_1 = arith.constant 0 : i32
    return %arg1, %c0_i32, %c0_i32_0 : i32, i32, i32
  }
  func.func @transform_12(%arg0: i32, %arg1: i32) -> (i32, i32, i32) {
    %c0_i32 = arith.constant 0 : i32
    %c0_i32_0 = arith.constant 0 : i32
    %c0_i32_1 = arith.constant 0 : i32
    return %arg0, %c0_i32, %c0_i32_0 : i32, i32, i32
  }
}

</mosaic_0001>

<bundles_post_ra>
// kernel: tpu_custom_call.1
= control target key start
LH: loop header
LB: loop body
LE: loop exit
PB: predicated region body
PF: predicated region fallthrough
CT: control target
= control target key end

     0   :  { %s5886_s0 = inlined_call_operand.hbm [shape: f32[2,16,64], index: 0, kind: input, shape index: {}]   ;;  %s5887_s1 = inlined_call_operand.hbm [shape: bf16[64,128], index: 1, kind: input, shape index: {}]   ;;  %s5888_s2 = inlined_call_operand.hbm [shape: f32[3,128], index: 2, kind: input, shape index: {}]   ;;  %s5889_s3 = inlined_call_operand.hbm [shape: bf16[16,128], index: 3, kind: input, shape index: {}]   ;;  %s5890_s4 = inlined_call_operand.hbm [shape: f32[2,128], index: 4, kind: input, shape index: {}]   ;;  %s5891_s5 = inlined_call_operand.hbm [shape: bf16[2,128,384], index: 5, kind: input, shape index: {}]   ;;  %s5892_s6 = inlined_call_operand.hbm [shape: f32[2,1,384], index: 6, kind: input, shape index: {}]   ;;  %s5893_s7 = inlined_call_operand.hbm [shape: bf16[2,128,128], index: 7, kind: input, shape index: {}]   ;;  %s5894_s8 = inlined_call_operand.hbm [shape: bf16[2,128,256], index: 8, kind: input, shape index: {}]   ;;  %s5895_s9 = inlined_call_operand.hbm [shape: f32[2,1,256], index: 9, kind: input, shape index: {}]   ;;  %s5896_s10 = inlined_call_operand.hbm [shape: bf16[2,256,128], index: 10, kind: input, shape index: {}]   ;;  %s5897_s11 = inlined_call_operand.hbm [shape: f32[2,6,128], index: 11, kind: input, shape index: {}]   ;;  %s5898_s12 = inlined_call_operand.hbm [shape: f32[2,16,128], index: 12, kind: output, shape index: {}]  }
   0x1   :  { %5943 = sst [smem:[#allocation43_spill]] %s5886_s0 }
   0x2   :  { %5944 = sst [smem:[#allocation44_spill]] %s5887_s1 }
   0x3   :  { %5945 = sst [smem:[#allocation45_spill]] %s5888_s2 }
   0x4   :  { %5946 = sst [smem:[#allocation46_spill]] %s5889_s3 }
   0x5   :  { %5947 = sst [smem:[#allocation47_spill]] %s5890_s4 }
   0x6   :  { %5948 = sst [smem:[#allocation48_spill]] %s5891_s5 }
   0x7   :  { %5949 = sst [smem:[#allocation49_spill]] %s5892_s6 }
   0x8   :  { %5950 = sst [smem:[#allocation50_spill]] %s5893_s7 }
   0x9   :  { %5951 = sst [smem:[#allocation51_spill]] %s5894_s8 }
   0xa   :  { %5952 = sst [smem:[#allocation52_spill]] %s5895_s9 }
   0xb   :  { %5953 = sst [smem:[#allocation53_spill]] %s5896_s10 }
   0xc   :  { %5954 = sst [smem:[#allocation54_spill]] %s5897_s11 }
   0xd   :  { %5955 = sst [smem:[#allocation55_spill]] %s5898_s12 }
   0xe   :  { %17 = vsyncpa [#allocation3], 0 }
   0xf   :  { %19 = vsyncpa [#allocation3 + $0x1], 0 }
  0x10   :  { %20 = vsyncpa [#allocation6], 0 }
  0x11   :  { %21 = vsyncpa [#allocation9], 0 }
  0x12   :  { %22 = vsyncpa [#allocation12], 0 }
  0x13   :  { %24 = vsyncpa [#allocation12 + $0x1], 0 }
  0x14   :  { %25 = vsyncpa [#allocation15], 0 }
  0x15   :  { %27 = vsyncpa [#allocation15 + $0x1], 0 }
  0x16   :  { %28 = vsyncpa [#allocation18], 0 }
  0x17   :  { %30 = vsyncpa [#allocation18 + $0x1], 0 }
  0x18   :  { %31 = vsyncpa [#allocation21], 0 }
  0x19   :  { %33 = vsyncpa [#allocation21 + $0x1], 0 }
  0x1a   :  { %34 = vsyncpa [#allocation4], 0 }
  0x1b   :  { %36 = vsyncpa [#allocation4 + $0x1], 0  ;;  %s4810_s21 = smov 0   ;;  %s4812_s22 = smov 0  }
  0x1c   :  { %s4814_s23 = smov 0   ;;  %s4816_s24 = smov 0  }
  0x1d   :  { %s4818_s25 = smov 0   ;;  %s4820_s26 = smov 0  }
  0x1e   :  { %s4822_s27 = smov 0   ;;  %s4824_s28 = smov 0  }
  0x1f   :  { %s4826_s29 = smov 0   ;;  %s4828_s30 = smov 0  }
  0x20   :  { %s4830_s13 = smov 0  }
  0x21 LB: > { %5956 = sst [smem:[#allocation31_spill]] %s4676_s22  ;;  %s4864_s14 = sadd.s32 4294967295, %s4712_s13   ;;  %s4712_s13 = sphi %s4830_s13, %s42_s13   ;;  %s4708_s30 = sphi %s4828_s30, %s6034_s30   ;;  %s4704_s29 = sphi %s4826_s29, %s6038_s29   ;;  %s4700_s28 = sphi %s4824_s28, %s6032_s28   ;;  %s4696_s27 = sphi %s4822_s27, %s6037_s27   ;;  %s4692_s26 = sphi %s4820_s26, %s6031_s26   ;;  %s4688_s25 = sphi %s4818_s25, %s6036_s25   ;;  %s4684_s24 = sphi %s4816_s24, %s6035_s24   ;;  %s4680_s23 = sphi %s4814_s23, %s6029_s23   ;;  %s4676_s22 = sphi %s4812_s22, %s6028_s22   ;;  %s4672_s21 = sphi %s4810_s21, %s6027_s21  }
  0x22   : > { %5957 = sst [smem:[#allocation32_spill]] %s4680_s23  ;;  %p5907_p0 = scmp.eq.s32.totalorder %s4712_s13, 0 }
  0x23   : > { %5958 = sst [smem:[#allocation33_spill]] %s4692_s26  ;;  %p5906_p1 = scmp.eq.s32.totalorder %s4864_s14, 0 }
  0x24   : > { %5959 = sst [smem:[#allocation34_spill]] %s4696_s27  ;;  %p178_p2 = scmp.ne.s32.totalorder %s4680_s23, %s4676_s22 }
  0x25   : > { %5960 = sst [smem:[#allocation35_spill]] %s4700_s28  ;;  %p184_p3 = scmp.ne.s32.totalorder %s4676_s22, %s4672_s21 }
  0x26   : > { %5961 = sst [smem:[#allocation36_spill]] %s4708_s30  ;;  %p180_p5 = por %p178_p2, %p5907_p0 }
  0x27   : > { %p3568_p6 = scmp.ge.s32.totalorder %s4712_s13, 1  ;;  %p4877_p7 = por %p184_p3, %p5906_p1 }
  0x28   : > { %p377_p8 = scmp.lt.s32.totalorder %s4712_s13, 5  ;;  %s4714_s17 = smov [#allocation5]  }
  0x29   : > { %s5962_s15 = scalar_select %p4877_p7, 1, 0 }
  0x2a   : > { %p4882_p9 = pnand %p3568_p6, %p377_p8  ;;  %s389_s18 = sshll.u32 %s4714_s17, 4  ;;  %s4886_s18 = int_to_ptr.vmem [resolvable:$true] %s389_s18 }
  0x2b   : > { %5963 = sst [smem:[#allocation37_spill]] %s5962_s15  ;;  %p5905_p11 = scmp.lt.s32.totalorder %s4712_s13, 4 }
  0x2c   : > { %s5964_s16 = scalar_select %p4882_p9, 1, 0 }
  0x2d   : > { %p3917_p10 = pneg %p4882_p9  ;;  %p4899_p13 = pnand %p5905_p11, %p180_p5 }
  0x2e   : > { %5965 = sst [smem:[#allocation38_spill]] %s5964_s16  ;;  %s4715_s21 = smov [#allocation8]  }
  0x2f   : > { %p4893_p12 = pnand %p3917_p10, %p5906_p1  ;;  %s413_s12 = sshll.u32 %s4715_s21, 4  ;;  %s4903_s12 = int_to_ptr.vmem [resolvable:$true] %s413_s12 }
  0x30   : > { %s5967_s20 = scalar_select %p4899_p13, 1, 0 }
  0x31   : > { %s5966_s19 = scalar_select %p4893_p12, 1, 0 }
  0x32   : > { %s5968_s1 = sld [smem:[#allocation44_spill]]  ;;  %p4913_p3 = pneg %p4893_p12 }
  0x34   : > { %s5969_s16 = scalar_select %p4913_p3, 1, 0 }
  0x38   : > { %s4214_s27 = scalar_lea.hbm %s5968_s1, 512 }
  0x39   : > { %p4215_p2 = scmp.ne.s32.totalorder %s5968_s1, %s4214_s27  ;;  %p4221_p8 = scmp.lt.u32.totalorder %s4214_s27, %s5968_s1 }
  0x3b   : > { %p4217_p5 = pnand %p4913_p3, %p4215_p2 }
  0x3d   : > { %p4218_p6 = pneg %p4217_p5 }
  0x3f   : > { %p4223_p10 = pnand %p4221_p8, %p4218_p6 }
  0x41   : > { %4226 = shalt.err (!%p4223_p10)
}
  0x42   : > { %s4227_s22 = scalar_lea.vmem %s4886_s18, 512  ;;  %p4235_p0 = scmp.lt.s32.totalorder %s4886_s18, %s4886_s18 }
  0x43   : > { %p4228_p11 = scmp.ne.s32.totalorder %s4886_s18, %s4227_s22  ;;  %p4236_p7 = scmp.lt.s32.totalorder %s4227_s22, %s4227_s22 }
  0x45   : > { %p4230_p4 = pnand %p4228_p11, %p4913_p3  ;;  %p4237_p2 = por %p4236_p7, %p4235_p0 }
  0x47   : > { %p4231_p1 = pneg %p4230_p4 }
  0x49   : > { %p4238_p5 = pnand %p4237_p2, %p4231_p1 }
  0x4b   : > { %4241 = shalt.err (!%p4238_p5)
}
  0x4c   : > { %s5913_s28 = smov 64   ;;  %s5915_s11 = smov 4  }
  0x4d   : > { %3920 = dma.hbm_to_vmem [thread:$0]  (!%p4893_p12), %s5968_s1, 512, %s4886_s18, [#allocation6], %s5913_s28, %s5913_s28, %s5915_s11  }
  0x4e   : > { %s5970_s3 = sld [smem:[#allocation46_spill]] }
  0x54   : > { %s4242_s22 = scalar_lea.hbm %s5970_s3, 128 }
  0x55   : > { %p4243_p0 = scmp.ne.s32.totalorder %s5970_s3, %s4242_s22  ;;  %p4249_p7 = scmp.lt.u32.totalorder %s4242_s22, %s5970_s3 }
  0x57   : > { %p4245_p1 = pnand %p4243_p0, %p4913_p3 }
  0x59   : > { %p4246_p4 = pneg %p4245_p1 }
  0x5b   : > { %p4251_p11 = pnand %p4249_p7, %p4246_p4 }
  0x5d   : > { %4254 = shalt.err (!%p4251_p11)
}
  0x5e   : > { %s4255_s18 = scalar_lea.vmem %s4903_s12, 128  ;;  %p4263_p2 = scmp.lt.s32.totalorder %s4903_s12, %s4903_s12 }
  0x5f   : > { %p4256_p6 = scmp.ne.s32.totalorder %s4903_s12, %s4255_s18  ;;  %p4264_p5 = scmp.lt.s32.totalorder %s4255_s18, %s4255_s18 }
  0x61   : > { %p4258_p8 = pnand %p4256_p6, %p4913_p3  ;;  %p4265_p0 = por %p4264_p5, %p4263_p2 }
  0x63   : > { %p4259_p10 = pneg %p4258_p8 }
  0x65   : > { %p4266_p1 = pnand %p4265_p0, %p4259_p10 }
  0x67   : > { %4269 = shalt.err (!%p4266_p1)
}
  0x68   : > { %3926 = dma.hbm_to_vmem [thread:$0]  (!%p4893_p12), %s5970_s3, 128, %s4903_s12, [#allocation9], %s5913_s28, %s5913_s28, %s5915_s11  }
  0x69   : > { %s4964_s8 = sand.u32 1, %s4712_s13   ;;  %s4967_s10 = sand.u32 1, %s4680_s23  }
  0x6a   : > { %s3877_s27 = smul.u32 192, %s4967_s10  ;;  %s5971_s5 = sld [smem:[#allocation48_spill]] }
  0x6b   : > { %s3878_s15 = smul.u32 3072, %s4704_s29  ;;  %s5924_s6 = scalar_lea.sflag [#allocation12], %s4964_s8 }
  0x6c   : > { %s463_s18 = scalar_lea.vmem [#allocation11], %s3877_s27  ;;  %p4984_p7 = pneg %p4899_p13 }
  0x6d   : > { %s470_s12 = sshll.u32 %s463_s18, 4  ;;  %s4976_s12 = int_to_ptr.vmem [resolvable:$true] %s470_s12 }
  0x6e   : > { %s5972_s11 = scalar_select %p4984_p7, 1, 0 }
  0x70   : > { %s4974_s22 = scalar_lea.hbm %s5971_s5, %s3878_s15  ;;  %s4275_s27 = scalar_lea.hbm %s5971_s5, 6144 }
  0x71   : > { %s4270_s28 = scalar_lea.hbm %s4974_s22, 3072  ;;  %p4276_p8 = scmp.lt.u32.totalorder %s4974_s22, %s5971_s5 }
  0x72   : > { %p4271_p4 = scmp.ne.s32.totalorder %s4974_s22, %s4270_s28  ;;  %p4277_p10 = scmp.lt.u32.totalorder %s4275_s27, %s4270_s28 }
  0x73   : > { %p4279_p5 = scmp.lt.u32.totalorder %s4270_s28, %s4974_s22 }
  0x74   : > { %p4273_p11 = pnand %p4984_p7, %p4271_p4  ;;  %p4278_p2 = por %p4277_p10, %p4276_p8 }
  0x76   : > { %p4274_p6 = pneg %p4273_p11  ;;  %p4280_p0 = por %p4279_p5, %p4278_p2 }
  0x78   : > { %p4281_p1 = pnand %p4280_p0, %p4274_p6 }
  0x7a   : > { %4284 = shalt.err (!%p4281_p1)
}
  0x7b   : > { %s4285_s0 = scalar_lea.vmem %s4976_s12, 3072  ;;  %s4718_s15 = smov [#allocation11]  }
  0x7c   : > { %p4286_p4 = scmp.ne.s32.totalorder %s4976_s12, %s4285_s0  ;;  %s4290_s17 = sshll.u32 %s4718_s15, 4  ;;  %s4291_s17 = int_to_ptr.vmem [resolvable:$false] %s4290_s17 }
  0x7d   : > { %s4292_s21 = scalar_lea.vmem %s4291_s17, 6144  ;;  %p4293_p12 = scmp.lt.s32.totalorder %s4976_s12, %s4291_s17 }
  0x7e   : > { %p4288_p11 = pnand %p4286_p4, %p4984_p7  ;;  %p4294_p3 = scmp.lt.s32.totalorder %s4292_s21, %s4285_s0 }
  0x80   : > { %p4289_p9 = pneg %p4288_p11  ;;  %p4295_p8 = por %p4294_p3, %p4293_p12 }
  0x82   : > { %p4296_p10 = pnand %p4295_p8, %p4289_p9 }
  0x84   : > { %4299 = shalt.err (!%p4296_p10)
}
  0x85   : > { %s4719_s28 = smov 192   ;;  %s4720_s27 = smov 12  }
  0x86   : > { %3936 = dma.hbm_to_vmem [thread:$0]  (!%p4899_p13), %s4974_s22, 3072, %s4976_s12, %s5924_s6, %s4719_s28, %s4719_s28, %s4720_s27  }
  0x87   : > { %s3707_s18 = sshll.u32 %s4704_s29, 10  ;;  %s5973_s7 = sld [smem:[#allocation50_spill]] }
  0x88   : > { %s5974_s21 = sshll.u32 %s4967_s10, 6  ;;  %s5925_s5 = scalar_lea.sflag [#allocation15], %s4964_s8 }
  0x89   : > { %s503_s1 = scalar_lea.vmem [#allocation14], %s5974_s21 }
  0x8a   : > { %s510_s3 = sshll.u32 %s503_s1, 4  ;;  %s5017_s3 = int_to_ptr.vmem [resolvable:$true] %s510_s3 }
  0x8d   : > { %s5013_s0 = scalar_lea.hbm %s5973_s7, %s3707_s18  ;;  %s4305_s28 = scalar_lea.hbm %s5973_s7, 2048 }
  0x8e   : > { %s4300_s23 = scalar_lea.hbm %s5013_s0, 1024  ;;  %p4306_p6 = scmp.lt.u32.totalorder %s5013_s0, %s5973_s7 }
  0x8f   : > { %p4301_p9 = scmp.ne.s32.totalorder %s5013_s0, %s4300_s23  ;;  %p4307_p2 = scmp.lt.u32.totalorder %s4305_s28, %s4300_s23 }
  0x90   : > { %p4309_p0 = scmp.lt.u32.totalorder %s4300_s23, %s5013_s0 }
  0x91   : > { %p4303_p12 = pnand %p4301_p9, %p4984_p7  ;;  %p4308_p5 = por %p4307_p2, %p4306_p6 }
  0x93   : > { %p4304_p3 = pneg %p4303_p12  ;;  %p4310_p1 = por %p4309_p0, %p4308_p5 }
  0x95   : > { %p4311_p4 = pnand %p4310_p1, %p4304_p3 }
  0x97   : > { %4314 = shalt.err (!%p4311_p4)
}
  0x98   : > { %s4315_s1 = scalar_lea.vmem %s5017_s3, 1024  ;;  %s4721_s15 = smov [#allocation14]  }
  0x99   : > { %p4316_p11 = scmp.ne.s32.totalorder %s5017_s3, %s4315_s1  ;;  %s4320_s17 = sshll.u32 %s4721_s15, 4  ;;  %s4321_s17 = int_to_ptr.vmem [resolvable:$false] %s4320_s17 }
  0x9a   : > { %s4322_s21 = scalar_lea.vmem %s4321_s17, 2048  ;;  %p4323_p9 = scmp.lt.s32.totalorder %s5017_s3, %s4321_s17 }
  0x9b   : > { %p4318_p8 = pnand %p4316_p11, %p4984_p7  ;;  %p4324_p12 = scmp.lt.s32.totalorder %s4322_s21, %s4315_s1 }
  0x9d   : > { %p4319_p10 = pneg %p4318_p8  ;;  %p4325_p6 = por %p4324_p12, %p4323_p9 }
  0x9f   : > { %p4326_p2 = pnand %p4325_p6, %p4319_p10 }
  0xa1   : > { %4329 = shalt.err (!%p4326_p2)
}
  0xa2   : > { %s5975_s23 = smov 4   ;;  %s5976_s22 = smov 64  }
  0xa3   : > { %3942 = dma.hbm_to_vmem [thread:$0]  (!%p4899_p13), %s5013_s0, 1024, %s5017_s3, %s5925_s5, %s5976_s22, %s5976_s22, %s5975_s23  }
  0xa4   : > { %s3585_s12 = sshll.u32 %s4967_s10, 1  ;;  %s3709_s28 = sshll.u32 %s4704_s29, 5 }
  0xa5   : > { %s5977_s9 = sld [smem:[#allocation52_spill]]  ;;  %s545_s15 = scalar_lea.vmem [#allocation17], %s3585_s12 }
  0xa6   : > { %s553_s17 = sshll.u32 %s545_s15, 4  ;;  %s4722_s21 = smov [#allocation7]   ;;  %s5053_s17 = int_to_ptr.vmem [resolvable:$true] %s553_s17 }
  0xa7   : > { %s5055_s6 = sshll.u32 %s4722_s21, 4  ;;  %s5930_s7 = scalar_lea.sflag [#allocation18], %s4964_s8  ;;  %s404_s6 = int_to_ptr.vmem [resolvable:$true] %s5055_s6 }
  0xab   : > { %s5051_s1 = scalar_lea.hbm %s5977_s9, %s3709_s28  ;;  %s4335_s27 = scalar_lea.hbm %s5977_s9, 64 }
  0xac   : > { %s4330_s3 = scalar_lea.hbm %s5051_s1, 32  ;;  %p4336_p1 = scmp.lt.u32.totalorder %s5051_s1, %s5977_s9 }
  0xad   : > { %p4331_p3 = scmp.ne.s32.totalorder %s5051_s1, %s4330_s3  ;;  %p4337_p4 = scmp.lt.u32.totalorder %s4335_s27, %s4330_s3 }
  0xae   : > { %p4339_p8 = scmp.lt.u32.totalorder %s4330_s3, %s5051_s1 }
  0xaf   : > { %p4333_p5 = pnand %p4331_p3, %p4984_p7  ;;  %p4338_p11 = por %p4337_p4, %p4336_p1 }
  0xb1   : > { %p4334_p0 = pneg %p4333_p5  ;;  %p4340_p10 = por %p4339_p8, %p4338_p11 }
  0xb3   : > { %p4341_p9 = pnand %p4340_p10, %p4334_p0 }
  0xb5   : > { %4344 = shalt.err (!%p4341_p9)
}
  0xb6   : > { %s4345_s12 = scalar_lea.vmem %s5053_s17, 32  ;;  %s4723_s15 = smov [#allocation17]  }
  0xb7   : > { %p4346_p12 = scmp.ne.s32.totalorder %s5053_s17, %s4345_s12  ;;  %s4350_s21 = sshll.u32 %s4723_s15, 4  ;;  %s4351_s21 = int_to_ptr.vmem [resolvable:$false] %s4350_s21 }
  0xb8   : > { %s4352_s5 = scalar_lea.vmem %s4351_s21, 64  ;;  %p4353_p3 = scmp.lt.s32.totalorder %s5053_s17, %s4351_s21 }
  0xb9   : > { %p4348_p6 = pnand %p4346_p12, %p4984_p7  ;;  %p4354_p5 = scmp.lt.s32.totalorder %s4352_s5, %s4345_s12 }
  0xbb   : > { %p4349_p2 = pneg %p4348_p6  ;;  %p4355_p1 = por %p4354_p5, %p4353_p3 }
  0xbd   : > { %p4356_p4 = pnand %p4355_p1, %p4349_p2 }
  0xbf   : > { %4359 = shalt.err (!%p4356_p4)
}
  0xc0   : > { %3948 = dma.hbm_to_vmem [thread:$0]  (!%p4899_p13), %s5051_s1, 32, %s5053_s17, %s5930_s7  }
  0xc1   : > { %s5978_s2 = sld [smem:[#allocation45_spill]]  ;;  %p5979_p11 = scmp.ne.s32.totalorder %s5969_s16, 0 }
  0xc7   : > { %s4360_s28 = scalar_lea.hbm %s5978_s2, 64 }
  0xc8   : > { %p4361_p0 = scmp.ne.s32.totalorder %s5978_s2, %s4360_s28  ;;  %p4367_p9 = scmp.lt.u32.totalorder %s4360_s28, %s5978_s2 }
  0xca   : > { %p4363_p8 = pnand %p4361_p0, %p5979_p11 }
  0xcc   : > { %p4364_p10 = pneg %p4363_p8 }
  0xce   : > { %p4369_p12 = pnand %p4367_p9, %p4364_p10 }
  0xd0   : > { %4372 = shalt.err (!%p4369_p12)
}
  0xd1   : > { %s4373_s21 = scalar_lea.vmem %s404_s6, 64  ;;  %p4381_p5 = scmp.lt.s32.totalorder %s404_s6, %s404_s6 }
  0xd2   : > { %p4374_p6 = scmp.ne.s32.totalorder %s404_s6, %s4373_s21  ;;  %p4382_p1 = scmp.lt.s32.totalorder %s4373_s21, %s4373_s21 }
  0xd4   : > { %p4376_p2 = pnand %p4374_p6, %p5979_p11  ;;  %p4383_p4 = por %p4382_p1, %p4381_p5 }
  0xd6   : > { %p4377_p3 = pneg %p4376_p2 }
  0xd8   : > { %p4384_p13 = pnand %p4383_p4, %p4377_p3 }
  0xda   : > { %4387 = shalt.err (!%p4384_p13)
}
  0xdb   : > { %p5980_p0 = scmp.ne.s32.totalorder %s5966_s19, 0  ;;  %s4724_s5 = smov [#allocation10]  }
  0xdc   : > { %s427_s3 = sshll.u32 %s4724_s5, 4  ;;  %s5981_s4 = sld [smem:[#allocation47_spill]]  ;;  %s428_s3 = int_to_ptr.vmem [resolvable:$true] %s427_s3 }
  0xdd   : > { %3923 = dma.hbm_to_vmem [thread:$0]  (!%p5980_p0), %s5978_s2, 64, %s404_s6, [#allocation6]  }
  0xe2   : > { %s4388_s27 = scalar_lea.hbm %s5981_s4, 32 }
  0xe3   : > { %p4389_p8 = scmp.ne.s32.totalorder %s5981_s4, %s4388_s27  ;;  %p4395_p9 = scmp.lt.u32.totalorder %s4388_s27, %s5981_s4 }
  0xe5   : > { %p4391_p13 = pnand %p4389_p8, %p5979_p11 }
  0xe7   : > { %p4392_p10 = pneg %p4391_p13 }
  0xe9   : > { %p4397_p12 = pnand %p4395_p9, %p4392_p10 }
  0xeb   : > { %4400 = shalt.err (!%p4397_p12)
}
  0xec   : > { %s4401_s6 = scalar_lea.vmem %s428_s3, 32  ;;  %p4409_p5 = scmp.lt.s32.totalorder %s428_s3, %s428_s3 }
  0xed   : > { %p4402_p6 = scmp.ne.s32.totalorder %s428_s3, %s4401_s6  ;;  %p4410_p1 = scmp.lt.s32.totalorder %s4401_s6, %s4401_s6 }
  0xef   : > { %p4404_p2 = pnand %p4402_p6, %p5979_p11  ;;  %p4411_p4 = por %p4410_p1, %p4409_p5 }
  0xf1   : > { %p4405_p3 = pneg %p4404_p2 }
  0xf3   : > { %p4412_p7 = pnand %p4411_p4, %p4405_p3 }
  0xf5   : > { %4415 = shalt.err (!%p4412_p7)
}
  0xf6   : > { %3929 = dma.hbm_to_vmem [thread:$0]  (!%p5980_p0), %s5981_s4, 32, %s428_s3, [#allocation9]  }
  0xf7   : > { %s5982_s16 = sld [smem:[#allocation32_spill]]  ;;  %s3567_s19 = sadd.s32 4294967294, %s4712_s13  }
  0xf8   : > { %s51_s5 = sadd.s32 1, %s4704_s29  ;;  %s54_s0 = sadd.s32 1, %s4708_s30 }
  0xf9   : > { %p52_p7 = scmp.ge.s32.totalorder %s51_s5, 2  ;;  %s61_s28 = sadd.s32 1, %s4692_s26 }
  0xfa   : > { %p68_p11 = scmp.ne.s32.totalorder %s4692_s26, %s4688_s25  ;;  %p5984_p8 = scmp.eq.s32.totalorder %s4712_s13, 0 }
  0xfb   : > { %s6040_s5 = smov (%p52_p7, %s51_s5), 0  ;;  %s6042_s0 = smov (!%p52_p7, %s54_s0), %s4708_s30 }
  0xfc   : > { %5983 = sst [smem:[#allocation39_spill]] %s6040_s5  ;;  %p5129_p0 = por %p5984_p8, %p68_p11 }
  0xfd   : > { %p74_p13 = scmp.ne.s32.totalorder %s4688_s25, %s4684_s24  ;;  %p56_p10 = scmp.ge.s32.totalorder %s6042_s0, 2 }
  0xfe   : > { %s168_s27 = ssub.s32 %s4704_s29, %s6040_s5  ;;  %p5986_p9 = scmp.eq.s32.totalorder %s4864_s14, 0 }
  0xff   : > { %p169_p6 = scmp.eq.s32.totalorder %s168_s27, 0  ;;  %s6044_s0 = smov (%p56_p10, %s6042_s0), 0 }
 0x100   : > { %p5142_p12 = por %p5986_p9, %p74_p13  ;;  %5988 = sst [smem:[#allocation40_spill]] %s6044_s0 }
 0x101   : > { %s171_s12 = sadd.s32 1, %s5982_s16  ;;  %p5989_p2 = scmp.eq.s32.totalorder %s4864_s14, 3 }
 0x102   : > { %s5987_s18 = scalar_select %p5142_p12, 1, 0 }
 0x103   : > { %p5151_p3 = por %p5989_p2, %p68_p11  ;;  %s58_s21 = ssub.s32 %s4708_s30, %s6044_s0 }
 0x104   : > { %p370_p5 = scmp.eq.s32.totalorder %s3567_s19, 3  ;;  %p59_p1 = scmp.eq.s32.totalorder %s58_s21, 0 }
 0x105   : > { %s5990_s15 = scalar_select %p5151_p3, 1, 0 }
 0x106   : > { %s438_s6 = sand.u32 1, %s4692_s26   ;;  %s6046_s16 = smov (!%p169_p6, %s5982_s16), %s171_s12 }
 0x107   : > { %5991 = sst [smem:[#allocation41_spill]] %s6046_s16  ;;  %p5167_p4 = por %p370_p5, %p74_p13 }
 0x108   : > { %s5162_s1 = scalar_select %p59_p1, %s4692_s26, %s61_s28  }
 0x109   : > { %s5993_s17 = scalar_select %p5167_p4, 1, 0 }
 0x10a   : > { %5992 = sst [smem:[#allocation42_spill]] %s5162_s1  ;;  %s3574_s27 = sshll.u32 %s438_s6, 4 }
 0x10b   : > { %s3706_s7 = sshll.u32 %s4708_s30, 8  ;;  %s5994_s9 = sld [smem:[#allocation43_spill]] }
 0x10c   : > { %s442_s19 = scalar_lea.vmem [#allocation2], %s3574_s27  ;;  %p5995_p7 = scmp.lt.s32.totalorder %s4712_s13, 4 }
 0x10d   : > { %s449_s12 = sshll.u32 %s442_s19, 4  ;;  %s5187_s21 = scalar_lea.sflag [#allocation3], %s438_s6  ;;  %s5185_s12 = int_to_ptr.vmem [resolvable:$true] %s449_s12 }
 0x10e   : > { %p5181_p11 = pnand %p5995_p7, %p5129_p0 }
 0x110   : > { %p4418_p13 = pneg %p5181_p11 }
 0x111   : > { %s5175_s5 = scalar_lea.hbm %s5994_s9, %s3706_s7  ;;  %s4421_s3 = scalar_lea.hbm %s5994_s9, 512 }
 0x112   : > { %s4416_s2 = scalar_lea.hbm %s5175_s5, 256  ;;  %p4422_p0 = scmp.lt.u32.totalorder %s5175_s5, %s5994_s9 }
 0x113   : > { %p4417_p8 = scmp.ne.s32.totalorder %s5175_s5, %s4416_s2  ;;  %p4423_p6 = scmp.lt.u32.totalorder %s4421_s3, %s4416_s2 }
 0x114   : > { %p4425_p5 = scmp.lt.u32.totalorder %s4416_s2, %s5175_s5 }
 0x115   : > { %p4419_p10 = pnand %p4418_p13, %p4417_p8  ;;  %p4424_p2 = por %p4423_p6, %p4422_p0 }
 0x117   : > { %p4420_p9 = pneg %p4419_p10  ;;  %p4426_p1 = por %p4425_p5, %p4424_p2 }
 0x119   : > { %p4427_p7 = pnand %p4426_p1, %p4420_p9 }
 0x11b   : > { %4430 = shalt.err (!%p4427_p7)
}
 0x11c   : > { %s4431_s6 = scalar_lea.vmem %s5185_s12, 256  ;;  %s4725_s4 = smov [#allocation2]  }
 0x11d   : > { %p4432_p8 = scmp.ne.s32.totalorder %s5185_s12, %s4431_s6  ;;  %s4436_s7 = sshll.u32 %s4725_s4, 4  ;;  %s4437_s7 = int_to_ptr.vmem [resolvable:$false] %s4436_s7 }
 0x11e   : > { %s4438_s27 = scalar_lea.vmem %s4437_s7, 512  ;;  %p4439_p3 = scmp.lt.s32.totalorder %s5185_s12, %s4437_s7 }
 0x11f   : > { %p4434_p10 = pnand %p4432_p8, %p4418_p13  ;;  %p4440_p0 = scmp.lt.s32.totalorder %s4438_s27, %s4431_s6 }
 0x121   : > { %p4435_p4 = pneg %p4434_p10  ;;  %p4441_p6 = por %p4440_p0, %p4439_p3 }
 0x123   : > { %p4442_p2 = pnand %p4441_p6, %p4435_p4 }
 0x125   : > { %4445 = shalt.err (!%p4442_p2)
}
 0x126   : > { %s5937_s2 = smov 128   ;;  %s5938_s3 = smov 8  }
 0x127   : > { %3933 = dma.hbm_to_vmem [thread:$0]  (!%p5181_p11), %s5175_s5, 256, %s5185_s12, %s5187_s21, %s5937_s2, %s5937_s2, %s5938_s3  }
 0x128   : > { %s3879_s19 = smul.u32 3, %s4967_s10  ;;  %s3582_s6 = sshll.u32 %s4967_s10, 7 }
 0x129   : > { %s3880_s4 = smul.u32 48, %s4704_s29  ;;  %s3708_s7 = sshll.u32 %s4704_s29, 11 }
 0x12a   : > { %s5997_s0 = sld [smem:[#allocation49_spill]]  ;;  %s484_s1 = scalar_lea.vmem [#allocation13], %s3879_s19 }
 0x12b   : > { %s492_s26 = sshll.u32 %s484_s1, 4  ;;  %s5998_s5 = sld [smem:[#allocation51_spill]]  ;;  %s493_s26 = int_to_ptr.vmem [resolvable:$true] %s492_s26 }
 0x12c   : > { %p5999_p4 = scmp.ne.s32.totalorder %s5972_s11, 0 }
 0x130   : > { %s5225_s30 = scalar_lea.hbm %s5997_s0, %s3880_s4  ;;  %s4451_s27 = scalar_lea.hbm %s5997_s0, 96 }
 0x131   : > { %s5232_s12 = scalar_lea.hbm %s5998_s5, %s3708_s7  ;;  %s4446_s21 = scalar_lea.hbm %s5225_s30, 48 }
 0x132   : > { %p4447_p3 = scmp.ne.s32.totalorder %s5225_s30, %s4446_s21  ;;  %p4452_p9 = scmp.lt.u32.totalorder %s5225_s30, %s5997_s0 }
 0x133   : > { %p4453_p5 = scmp.lt.u32.totalorder %s4451_s27, %s4446_s21  ;;  %p4455_p7 = scmp.lt.u32.totalorder %s4446_s21, %s5225_s30 }
 0x134   : > { %p4449_p11 = pnand %p4447_p3, %p5999_p4 }
 0x135   : > { %p4454_p1 = por %p4453_p5, %p4452_p9 }
 0x136   : > { %p4450_p13 = pneg %p4449_p11 }
 0x137   : > { %p4456_p8 = por %p4455_p7, %p4454_p1 }
 0x139   : > { %p4457_p10 = pnand %p4456_p8, %p4450_p13 }
 0x13b   : > { %4460 = shalt.err (!%p4457_p10)
}
 0x13c   : > { %s4461_s16 = scalar_lea.vmem %s493_s26, 48  ;;  %s4728_s1 = smov [#allocation13]  }
 0x13d   : > { %p4462_p0 = scmp.ne.s32.totalorder %s493_s26, %s4461_s16  ;;  %s4466_s19 = sshll.u32 %s4728_s1, 4  ;;  %s4467_s19 = int_to_ptr.vmem [resolvable:$false] %s4466_s19 }
 0x13e   : > { %s4468_s28 = scalar_lea.vmem %s4467_s19, 96  ;;  %p4469_p3 = scmp.lt.s32.totalorder %s493_s26, %s4467_s19 }
 0x13f   : > { %p4464_p6 = pnand %p4462_p0, %p5999_p4  ;;  %p4470_p11 = scmp.lt.s32.totalorder %s4468_s28, %s4461_s16 }
 0x141   : > { %p4465_p2 = pneg %p4464_p6  ;;  %p4471_p12 = por %p4470_p11, %p4469_p3 }
 0x143   : > { %p4472_p5 = pnand %p4471_p12, %p4465_p2 }
 0x145   : > { %4475 = shalt.err (!%p4472_p5)
}
 0x146   : > { %p6000_p9 = scmp.ne.s32.totalorder %s5967_s20, 0  ;;  %s6001_s2 = scalar_lea.sflag [#allocation12], %s4964_s8 }
 0x147   : > { %s524_s3 = scalar_lea.vmem [#allocation16], %s3582_s6  ;;  %s6002_s27 = sld [smem:[#allocation53_spill]] }
 0x148   : > { %3939 = dma.hbm_to_vmem [thread:$0]  (!%p6000_p9), %s5225_s30, 48, %s493_s26, %s6001_s2  }
 0x149   : > { %s531_s21 = sshll.u32 %s524_s3, 4  ;;  %s4476_s19 = scalar_lea.hbm %s5232_s12, 2048  ;;  %s5255_s21 = int_to_ptr.vmem [resolvable:$true] %s531_s21 }
 0x14a   : > { %p4477_p12 = scmp.ne.s32.totalorder %s5232_s12, %s4476_s19  ;;  %s4481_s26 = scalar_lea.hbm %s5998_s5, 4096 }
 0x14b   : > { %p4482_p7 = scmp.lt.u32.totalorder %s5232_s12, %s5998_s5  ;;  %p4483_p8 = scmp.lt.u32.totalorder %s4481_s26, %s4476_s19 }
 0x14c   : > { %p4479_p13 = pnand %p4477_p12, %p5999_p4  ;;  %p4485_p0 = scmp.lt.u32.totalorder %s4476_s19, %s5232_s12 }
 0x14d   : > { %s6003_s16 = smov %s6002_s27  ;;  %s5262_s1 = scalar_lea.hbm %s6002_s27, %s3708_s7 }
 0x14e   : > { %p4480_p1 = pneg %p4479_p13  ;;  %p4484_p10 = por %p4483_p8, %p4482_p7 }
 0x150   : > { %p4486_p6 = por %p4485_p0, %p4484_p10 }
 0x152   : > { %p4487_p2 = pnand %p4486_p6, %p4480_p1 }
 0x154   : > { %4490 = shalt.err (!%p4487_p2)
}
 0x155   : > { %s4491_s7 = scalar_lea.vmem %s5255_s21, 2048  ;;  %s4729_s0 = smov [#allocation16]  }
 0x156   : > { %p4492_p3 = scmp.ne.s32.totalorder %s5255_s21, %s4491_s7  ;;  %s4496_s3 = sshll.u32 %s4729_s0, 4  ;;  %s4497_s3 = int_to_ptr.vmem [resolvable:$false] %s4496_s3 }
 0x157   : > { %s4498_s9 = scalar_lea.vmem %s4497_s3, 4096  ;;  %p4499_p12 = scmp.lt.s32.totalorder %s5255_s21, %s4497_s3 }
 0x158   : > { %p4494_p11 = pnand %p4492_p3, %p5999_p4  ;;  %p4500_p13 = scmp.lt.s32.totalorder %s4498_s9, %s4491_s7 }
 0x15a   : > { %p4495_p5 = pneg %p4494_p11  ;;  %p4501_p7 = por %p4500_p13, %p4499_p12 }
 0x15c   : > { %p4502_p8 = pnand %p4501_p7, %p4495_p5 }
 0x15e   : > { %4505 = shalt.err (!%p4502_p8)
}
 0x15f   : > { %s6004_s4 = smov 8   ;;  %s6005_s27 = smov 128  }
 0x160   : > { %s6006_s19 = scalar_lea.sflag [#allocation15], %s4964_s8  ;;  %s564_s28 = scalar_lea.vmem [#allocation19], %s3582_s6 }
 0x161   : > { %3945 = dma.hbm_to_vmem [thread:$0]  (!%p6000_p9), %s5232_s12, 2048, %s5255_s21, %s6006_s19, %s6005_s27, %s6005_s27, %s6004_s4  }
 0x162   : > { %s571_s26 = sshll.u32 %s564_s28, 4  ;;  %s3591_s30 = sshll.u32 %s4967_s10, 3  ;;  %s5292_s26 = int_to_ptr.vmem [resolvable:$true] %s571_s26 }
 0x163   : > { %s4506_s2 = scalar_lea.hbm %s5262_s1, 2048  ;;  %s4511_s3 = scalar_lea.hbm %s6003_s16, 4096 }
 0x164   : > { %p4507_p1 = scmp.ne.s32.totalorder %s5262_s1, %s4506_s2  ;;  %p4512_p6 = scmp.lt.u32.totalorder %s5262_s1, %s6003_s16 }
 0x165   : > { %p4513_p2 = scmp.lt.u32.totalorder %s4511_s3, %s4506_s2  ;;  %p4515_p11 = scmp.lt.u32.totalorder %s4506_s2, %s5262_s1 }
 0x166   : > { %p4509_p10 = pnand %p4507_p1, %p5999_p4 }
 0x167   : > { %p4514_p3 = por %p4513_p2, %p4512_p6 }
 0x168   : > { %p4510_p0 = pneg %p4509_p10 }
 0x169   : > { %p4516_p5 = por %p4515_p11, %p4514_p3 }
 0x16b   : > { %p4517_p12 = pnand %p4516_p5, %p4510_p0 }
 0x16d   : > { %4520 = shalt.err (!%p4517_p12)
}
 0x16e   : > { %s4521_s6 = scalar_lea.vmem %s5292_s26, 2048  ;;  %s4730_s12 = smov [#allocation19]  }
 0x16f   : > { %p4522_p13 = scmp.ne.s32.totalorder %s5292_s26, %s4521_s6  ;;  %s4526_s21 = sshll.u32 %s4730_s12, 4  ;;  %s4527_s21 = int_to_ptr.vmem [resolvable:$false] %s4526_s21 }
 0x170   : > { %s4528_s5 = scalar_lea.vmem %s4527_s21, 4096  ;;  %p4529_p1 = scmp.lt.s32.totalorder %s5292_s26, %s4527_s21 }
 0x171   : > { %p4524_p7 = pnand %p4522_p13, %p5999_p4  ;;  %p4530_p10 = scmp.lt.s32.totalorder %s4528_s5, %s4521_s6 }
 0x173   : > { %p4525_p8 = pneg %p4524_p7  ;;  %p4531_p6 = por %p4530_p10, %p4529_p1 }
 0x175   : > { %p4532_p2 = pnand %p4531_p6, %p4525_p8 }
 0x177   : > { %4535 = shalt.err (!%p4532_p2)
}
 0x178   : > { %s6007_s4 = scalar_lea.sflag [#allocation18], %s4964_s8  ;;  %s3592_s27 = sshll.u32 %s4704_s29, 7 }
 0x179   : > { %3951 = dma.hbm_to_vmem [thread:$0]  (!%p6000_p9), %s5262_s1, 2048, %s5292_s26, %s6007_s4, %s5976_s22, %s5976_s22, %s5975_s23  }
 0x17a   : > { %s6008_s2 = sld [smem:[#allocation54_spill]]  ;;  %s585_s0 = scalar_lea.vmem [#allocation20], %s3591_s30 }
 0x17b   : > { %s592_s8 = sshll.u32 %s585_s0, 4  ;;  %s582_s3 = scalar_lea.sflag [#allocation21], %s4967_s10  ;;  %s593_s8 = int_to_ptr.vmem [resolvable:$true] %s592_s8 }
 0x180   : > { %s5325_s7 = scalar_lea.hbm %s6008_s2, %s3592_s27  ;;  %s4541_s1 = scalar_lea.hbm %s6008_s2, 256 }
 0x181   : > { %s4536_s9 = scalar_lea.hbm %s5325_s7, 128  ;;  %p4542_p5 = scmp.lt.u32.totalorder %s5325_s7, %s6008_s2 }
 0x182   : > { %p4537_p0 = scmp.ne.s32.totalorder %s5325_s7, %s4536_s9  ;;  %p4543_p12 = scmp.lt.u32.totalorder %s4541_s1, %s4536_s9 }
 0x183   : > { %p4545_p7 = scmp.lt.u32.totalorder %s4536_s9, %s5325_s7 }
 0x184   : > { %p4539_p3 = pnand %p4537_p0, %p5999_p4  ;;  %p4544_p13 = por %p4543_p12, %p4542_p5 }
 0x186   : > { %p4540_p11 = pneg %p4539_p3  ;;  %p4546_p8 = por %p4545_p7, %p4544_p13 }
 0x188   : > { %p4547_p1 = pnand %p4546_p8, %p4540_p11 }
 0x18a   : > { %4550 = shalt.err (!%p4547_p1)
}
 0x18b   : > { %s4551_s10 = scalar_lea.vmem %s593_s8, 128  ;;  %s4731_s30 = smov [#allocation20]  }
 0x18c   : > { %p4552_p10 = scmp.ne.s32.totalorder %s593_s8, %s4551_s10  ;;  %s4556_s12 = sshll.u32 %s4731_s30, 4  ;;  %s4557_s12 = int_to_ptr.vmem [resolvable:$false] %s4556_s12 }
 0x18d   : > { %s4558_s21 = scalar_lea.vmem %s4557_s12, 256  ;;  %p4559_p0 = scmp.lt.s32.totalorder %s593_s8, %s4557_s12 }
 0x18e   : > { %p4554_p6 = pnand %p4552_p10, %p5999_p4  ;;  %p4560_p3 = scmp.lt.s32.totalorder %s4558_s21, %s4551_s10 }
 0x190   : > { %p4555_p2 = pneg %p4554_p6  ;;  %p4561_p9 = por %p4560_p3, %p4559_p0 }
 0x192   : > { %p4562_p5 = pnand %p4561_p9, %p4555_p2 }
 0x194   : > { %4565 = shalt.err (!%p4562_p5)
}
 0x195   : > { %p6009_p12 = scmp.ne.s32.totalorder %s5967_s20, 0  ;;  %s6010_s5 = sld [smem:[#allocation38_spill]] }
 0x197   : > { %3954 = dma.hbm_to_vmem [thread:$0]  (!%p6009_p12), %s5325_s7, 128, %s593_s8, %s582_s3  }
 0x19b   : > { %p6011_p11 = scmp.ne.s32.totalorder %s6010_s5, 0 }
 0x19c   : > { %s5350_s11 = sand.u32 (!%p6011_p11), 1, %s4688_s25   ;;  %p6012_p4 = scmp.ne.s32.totalorder (!%p6011_p11), %s5987_s18, 0 }
 0x19d   : > { %601 = sbr.rel (%p6011_p11) target bundleno = 3952 (0xf70), region = 68  ;;  %s3594_s4 = sshll.u32 (!%p6011_p11), %s5350_s11, 4 }
 0x19e   : > { %s604_s27 = scalar_lea.sflag (!%p6011_p11), [#allocation3], %s5350_s11  ;;  %s5356_s19 = scalar_lea.vmem (!%p6011_p11), [#allocation2], %s3594_s4 }
 0x1a4   : > { %4639 = dma.done.wait (%p6012_p4), %s604_s27, 256  }
 0x1a5   : > { %4641 = vsyncadd (%p6012_p4), %s604_s27, 4294967040  ;;  %p6013_p9 = scmp.eq.s32.totalorder %s4864_s14, 0 }
 0x1a7   : > { %4643 = dma.done.wait (%p6013_p9), [#allocation6], 576   ;;  %p6014_p13 = pmov %p6013_p9 }
 0x1a8   : > { %p6015_p7 = pmov %p6013_p9 }
 0x1a9   : > { %4645 = vsyncadd (%p6014_p13), [#allocation6], 4294966720 }
 0x1aa   : > { %4647 = dma.done.wait (%p6015_p7), [#allocation9], 160   ;;  %p6016_p8 = pmov %p6015_p7 }
 0x1ab   : > { %s6017_s20 = sld [smem:[#allocation31_spill]]  ;;  %s6018_s28 = sld [smem:[#allocation37_spill]] }
 0x1ac   : > { %4649 = vsyncadd (%p6016_p8), [#allocation9], 4294967136  ;;  %s628_s7 = sand.u32 1, %s4864_s14  }
 0x1ad   : > { %s629_s18 = scalar_lea.sflag [#allocation12], %s628_s7 }
 0x1b1   : > { %s630_s0 = sand.u32 1, %s6017_s20   ;;  %p6019_p1 = scmp.ne.s32.totalorder %s6018_s28, 0 }
 0x1b2   : > { %s3881_s8 = smul.u32 192, %s630_s0 }
 0x1b4   : > { %s5372_s3 = scalar_lea.vmem [#allocation11], %s3881_s8 }
 0x1b5   : > { %4651 = dma.done.wait (%p6019_p1), %s629_s18, 3120  }
 0x1b6   : > { %4653 = vsyncadd (%p6019_p1), %s629_s18, 4294964176  ;;  %s3882_s9 = smul.u32 3, %s630_s0  ;;  %s3599_s23 = sshll.u32 %s630_s0, 6 }
 0x1b7   : > { %s647_s1 = scalar_lea.sflag [#allocation15], %s628_s7  ;;  %s5380_s26 = scalar_lea.vmem [#allocation14], %s3599_s23 }
 0x1b8   : > { %s5378_s22 = scalar_lea.vmem [#allocation13], %s3882_s9 }
 0x1b9   : > { %4655 = dma.done.wait (%p6019_p1), %s647_s1, 3072  }
 0x1ba   : > { %4657 = vsyncadd (%p6019_p1), %s647_s1, 4294964224  ;;  %s3600_s14 = sshll.u32 %s630_s0, 7  ;;  %s3601_s6 = sshll.u32 %s630_s0, 1 }
 0x1bb   : > { %s5386_s10 = scalar_lea.vmem [#allocation16], %s3600_s14  ;;  %s665_s30 = scalar_lea.sflag [#allocation18], %s628_s7 }
 0x1bc   : > { %s5388_s12 = scalar_lea.vmem [#allocation17], %s3601_s6 }
 0x1bd   : > { %4659 = dma.done.wait (%p6019_p1), %s665_s30, 2080  }
 0x1be   : > { %4661 = vsyncadd (%p6019_p1), %s665_s30, 4294965216  ;;  %s3603_s21 = sshll.u32 %s630_s0, 3  ;;  %s5394_s5 = scalar_lea.vmem [#allocation19], %s3600_s14 }
 0x1bf   : > { %s683_s27 = scalar_lea.sflag [#allocation21], %s630_s0  ;;  %s5396_s20 = scalar_lea.vmem [#allocation20], %s3603_s21 }
 0x1c0   : > { %4663 = dma.done.wait (%p6019_p1), %s683_s27, 128  }
 0x1c1   : > { %4665 = vsyncadd (%p6019_p1), %s683_s27, 4294967168  ;;  %s5404_s7 = scalar_lea.vmem [#allocation22], %s3594_s4  ;;  %s6020_s8 = sld [smem:[#allocation34_spill]] }
 0x1c7   : > { %p3605_p10 = scmp.ne.s32.totalorder %s6020_s8, 0 }
 0x1c8   : > { %v4079_v0 = vld [vmem:[#allocation5] sm:$0xff] (!%p3605_p10)   ;;  %v4732_v1 = vmov (!%p3605_p10), 0.0   ;;  %v4080_v2 = vld [vmem:[#allocation5 + $0x8] sm:$0xff] (!%p3605_p10)   ;;  %vm4733_vm0 = vmmov (!%p3605_p10), 0   ;;  %v4081_v3 = vld [vmem:[#allocation5 + $0x10] sm:$0xff] (!%p3605_p10)   ;;  %vm807_vm1 = vcmask (!%p3605_p10), 523264   ;;  %v779_v8 = vlaneseq (!%p3605_p10) }
 0x1c9   : > { %766 = sbr.rel (%p3605_p10) target bundleno = 1009 (0x3f1), region = 120  ;;  %3777 = vmatprep.subr.bf16.mxu0 (!%p3605_p10), %v4732_v1  ;;  %3785 = vmatprep.mubr.msk.bf16.mxu0 (!%p3605_p10), %vm4733_vm0, %v4732_v1  ;;  %v4082_v4 = vld [vmem:[#allocation5 + $0x18] sm:$0xff] (!%p3605_p10)   ;;  %v768_v5 = vld [vmem:[%s5356_s19] sm:$0xff] (!%p3605_p10) }
 0x1ca   : > { %3778 = vmatpush3.bf16.msra.mxu0 (!%p3605_p10), %v4079_v0  ;;  %v769_v6 = vld [vmem:[%s5356_s19 + $0x8] sm:$0xff] (!%p3605_p10)  ;;  %v780_v9 = vshrl.u32 (!%p3605_p10), %v779_v8, 7  ;;  %v767_v11 = vld [vmem:[#allocation7] sm:$0x7] (!%p3605_p10) }
 0x1cb   : > { %3779 = vmatprep.subr.bf16.mxu0 (!%p3605_p10), %v4732_v1  ;;  %v770_v7 = vpack.c.bf16 (!%p3605_p10), %v769_v6, %v768_v5  ;;  %v3713_v41 = vld [vmem:[#allocation8] sm:$0xff] (!%p3605_p10)  }
 0x1cc   : > { %v781_v10 = vsub.s32 (!%p3605_p10), 0, %v780_v9  ;;  %v877_v33 = vsub.s32 (!%p3605_p10), 1, %v780_v9  ;;  %v883_v34 = vsub.s32 (!%p3605_p10), 2, %v780_v9  ;;  %v3714_v44 = vunpack.c.l.bf16 (!%p3605_p10), %v3713_v41 }
 0x1cd   : > { %v3715_v50 = vunpack.c.h.bf16 (!%p3605_p10), %v3713_v41 }
 0x1ce   : > { %3780 = vmatpush3.bf16.msra.mxu0 (!%p3605_p10), %v4080_v2  ;;  %v782_v12 = vrot.slane (!%p3605_p10), %v767_v11, %v781_v10  ;;  %v878_v35 = vrot.slane (!%p3605_p10), %v767_v11, %v877_v33  ;;  %v884_v37 = vrot.slane (!%p3605_p10), %v767_v11, %v883_v34 }
 0x1cf   : > { %3781 = vmatprep.subr.bf16.mxu0 (!%p3605_p10), %v4732_v1 }
 0x1d2   : > { %3782 = vmatpush3.bf16.msra.mxu0 %v4081_v3 }
 0x1d3   : > { %3783 = vmatprep.subr.bf16.mxu0 %v4732_v1 }
 0x1d6   : > { %3784 = vmatpush3.bf16.msra.mxu0 %v4082_v4 }
 0x1d9   : > { %3786 = vmatmul.mubr.msk.bf16.vlgmr.msra.gmra.mrb[0].mxu0 %vm807_vm1, %v770_v7 }
 0x2ac   : > { %v845_v13 = vpop.f32.mrb[0].mxu0 }
 0x2ad   : > { %v846_v14 = vadd.f32 %v845_v13, %v782_v12  ;;  %v3787_v15 = vpop.f32.mrb[1].mxu0 }
 0x2ae   : > { %v848_v16 = vpop.f32.mrb[2].mxu0 }
 0x2af   : > { %v3788_v17 = vpop.f32.mrb[3].mxu0  ;;  %852 = vadd.xlane.f32.xlu0 %v846_v14  ;;  %v849_v18 = vadd.f32 %v848_v16, %v782_v12 }
 0x2b3   : > { %854 = vadd.xlane.f32.xlu0 %v849_v18 }
 0x33c   : > { %v853_v19 = vpop.xlane.xlu0 %852 }
 0x33d   : > { %v857_v20 = vmul.f32 0.0078125, %v853_v19 }
 0x33f   : > { %v859_v21 = vsub.f32 %v846_v14, %v857_v20 }
 0x340   : > { %v855_v22 = vpop.xlane.xlu0 %854 }
 0x341   : > { %v858_v23 = vmul.f32 0.0078125, %v855_v22  ;;  %v861_v24 = vmul.f32 %v859_v21, %v859_v21 }
 0x343   : > { %v860_v25 = vsub.f32 %v849_v18, %v858_v23  ;;  %863 = vadd.xlane.f32.xlu1 %v861_v24 }
 0x345   : > { %v862_v26 = vmul.f32 %v860_v25, %v860_v25 }
 0x347   : > { %865 = vadd.xlane.f32.xlu1 %v862_v26 }
 0x3d0   : > { %v864_v27 = vpop.xlane.xlu1 %863 }
 0x3d1   : > { %v867_v28 = vmul.f32 0.0078125, %v864_v27 }
 0x3d3   : > { %v869_v29 = vadd.f32 1e-05, %v867_v28 }
 0x3d4   : > { %v866_v30 = vpop.xlane.xlu1 %865 }
 0x3d5   : > { %4083 = vrsqrt.f32 %v869_v29  ;;  %v868_v31 = vmul.f32 0.0078125, %v866_v30 }
 0x3d7   : > { %v870_v32 = vadd.f32 1e-05, %v868_v31 }
 0x3d9   : > { %4085 = vrsqrt.f32 %v870_v32 }
 0x3df   : > { %v4084_v36 = vpop.eup %4083 }
 0x3e0   : > { %v873_v38 = vmul.f32 %v4084_v36, %v859_v21 }
 0x3e2   : > { %v879_v39 = vmul.f32 %v878_v35, %v873_v38 }
 0x3e3   : > { %v4086_v40 = vpop.eup %4085 }
 0x3e4   : > { %v885_v42 = vadd.f32 %v884_v37, %v879_v39  ;;  %v874_v43 = vmul.f32 %v4086_v40, %v860_v25 }
 0x3e6   : > { %v887_v45 = vmax.f32 %v885_v42, 0.0  ;;  %v880_v46 = vmul.f32 %v878_v35, %v874_v43 }
 0x3e8   : > { %v889_v47 = vmul.f32 11.313708, %v887_v45  ;;  %v886_v48 = vadd.f32 %v884_v37, %v880_v46 }
 0x3ea   : > { %v895_v49 = vadd.f32 %v3714_v44, %v889_v47  ;;  %v888_v51 = vmax.f32 %v886_v48, 0.0 }
 0x3ec   : > { %897 = vst [vmem:[%s5404_s7] sm:$0xff] %v895_v49  ;;  %v890_v52 = vmul.f32 11.313708, %v888_v51 }
 0x3ee   : > { %v896_v53 = vadd.f32 %v3715_v50, %v890_v52 }
 0x3f0   : > { %898 = vst [vmem:[%s5404_s7 + $0x8] sm:$0xff] %v896_v53 }
 0x3f1 PF: > { %v4087_v56 = vld [vmem:[%s5372_s3 + $0x4] ss:$12 sps:$4 sm:$0xff]   ;;  %v4089_v57 = vld [vmem:[%s5372_s3] ss:$12 sps:$4 sm:$0xff]   ;;  %v4734_v58 = vmov 0.0   ;;  %v4735_v20 = vmov 0   ;;  %v925_v30 = vlaneseq }
 0x3f2   : > { %3789 = vmatprep.subr.bf16.mxu1 %v4734_v58  ;;  %v4090_v59 = vld [vmem:[%s5372_s3 + $0x8] ss:$12 sps:$4 sm:$0xff]   ;;  %1115 = vmatprep.subr.bf16.mxu0 %v4087_v56  ;;  %v4093_v5 = vld [vmem:[%s5372_s3 + $0x18] ss:$12 sps:$4 sm:$0xff]   ;;  %v4094_v6 = vld [vmem:[%s5372_s3 + $0x20] ss:$12 sps:$4 sm:$0xff]  }
 0x3f3   : > { %v899_v54 = vld [vmem:[%s5404_s7] sm:$0xff]  ;;  %1116 = vmatpush1.bf16.msra.mxu0 %v4089_v57  ;;  %3790 = vmatpush3.bf16.msra.mxu1 %v4090_v59  ;;  %vm4736_vm2 = vmmov 0   ;;  %v5458_v33 = vshrl.u32 %v925_v30, 7  ;;  %v901_v35 = vld [vmem:[%s5396_s20] sm:$0x3f]  ;;  %s4737_s4 = smov 64  }
 0x3f4   : > { %902 = vadd.xlane.f32.xlu0 %v899_v54  ;;  %v4091_v60 = vld [vmem:[%s5372_s3 + $0x1c] ss:$12 sps:$4 sm:$0xff]   ;;  %3791 = vmatprep.subr.bf16.mxu1 %v4734_v58  ;;  %v4095_v7 = vld [vmem:[%s5372_s3 + $0x34] ss:$12 sps:$4 sm:$0xff]   ;;  %v4098_v9 = vld [vmem:[%s5372_s3 + $0x38] ss:$12 sps:$4 sm:$0xff]  }
 0x3f5   : > { %1117 = vmatprep.subr.bf16.mxu0 %v4091_v60  ;;  %v4097_v8 = vld [vmem:[%s5372_s3 + $0x30] ss:$12 sps:$4 sm:$0xff]   ;;  %v4099_v10 = vld [vmem:[%s5372_s3 + $0x4c] ss:$12 sps:$4 sm:$0xff]   ;;  %v4101_v11 = vld [vmem:[%s5372_s3 + $0x48] ss:$12 sps:$4 sm:$0xff]   ;;  %1147 = vmatprep.mubr.bf16.mxu0 %v4735_v20 }
 0x3f6   : > { %v4102_v12 = vld [vmem:[%s5372_s3 + $0x50] ss:$12 sps:$4 sm:$0xff]   ;;  %v4105_v14 = vld [vmem:[%s5372_s3 + $0x60] ss:$12 sps:$4 sm:$0xff]   ;;  %v4106_v15 = vld [vmem:[%s5372_s3 + $0x68] ss:$12 sps:$4 sm:$0xff]   ;;  %3805 = vmatprep.mubr.msk.bf16.mxu1 %vm4736_vm2, %v4734_v58 }
 0x3f7   : > { %v900_v55 = vld [vmem:[%s5404_s7 + $0x8] sm:$0xff]  ;;  %1118 = vmatpush1.bf16.msra.mxu0 %v4093_v5  ;;  %3792 = vmatpush3.bf16.msra.mxu1 %v4094_v6  ;;  %v5461_v34 = vsub.s32 0, %v5458_v33  ;;  %v5467_v39 = vsub.s32 1, %v5458_v33  ;;  %v982_v48 = vsub.s32 2, %v5458_v33  ;;  %s4738_s19 = smov 96   ;;  %s4739_s28 = smov 32  }
 0x3f8   : > { %904 = vadd.xlane.f32.xlu0 %v900_v55  ;;  %3793 = vmatprep.subr.bf16.mxu1 %v4734_v58  ;;  %v4103_v13 = vld [vmem:[%s5372_s3 + $0x64] ss:$12 sps:$4 sm:$0xff]   ;;  %v4107_v16 = vld [vmem:[%s5372_s3 + $0x7c] ss:$12 sps:$4 sm:$0xff]   ;;  %v4110_v18 = vld [vmem:[%s5372_s3 + $0x80] ss:$12 sps:$4 sm:$0xff]  }
 0x3f9   : > { %1119 = vmatprep.subr.bf16.mxu0 %v4095_v7  ;;  %v4109_v17 = vld [vmem:[%s5372_s3 + $0x78] ss:$12 sps:$4 sm:$0xff]   ;;  %v4111_v19 = vld [vmem:[%s5372_s3 + $0x94] ss:$12 sps:$4 sm:$0xff]   ;;  %v4113_v21 = vld [vmem:[%s5372_s3 + $0x90] ss:$12 sps:$4 sm:$0xff]   ;;  %v928_v38 = vrot.slane %v901_v35, %v5461_v34  ;;  %v934_v43 = vrot.slane %v901_v35, %v5467_v39 }
 0x3fa   : > { %v4114_v22 = vld [vmem:[%s5372_s3 + $0x98] ss:$12 sps:$4 sm:$0xff]   ;;  %v4117_v24 = vld [vmem:[%s5372_s3 + $0xa8] ss:$12 sps:$4 sm:$0xff]   ;;  %v4118_v25 = vld [vmem:[%s5372_s3 + $0xb0] ss:$12 sps:$4 sm:$0xff]  }
 0x3fb   : > { %1120 = vmatpush1.bf16.msra.mxu0 %v4097_v8  ;;  %3794 = vmatpush3.bf16.msra.mxu1 %v4098_v9  ;;  %v4115_v23 = vld [vmem:[%s5372_s3 + $0xac] ss:$12 sps:$4 sm:$0xff]   ;;  %v970_v49 = vld [vmem:[%s5378_s22] sm:$0x7]  ;;  %v4740_v7 = vmov 1983009808  }
 0x3fc   : > { %3795 = vmatprep.subr.bf16.mxu1 %v4734_v58  ;;  %1121 = vmatprep.subr.bf16.mxu0 %v4099_v10  ;;  %v975_v50 = vrot.slane %v970_v49, %v5461_v34  ;;  %v983_v51 = vrot.slane %v970_v49, %v982_v48  ;;  %v1233_v8 = vunpack.c.l.s4 %v4740_v7  ;;  %v4741_v10 = vmov 1934713408   ;;  %s6021_s0 = sld [smem:[#allocation34_spill]] }
 0x3fd   : > { %vm2013_vm3 = vcmask 261120   ;;  %vm2202_vm4 = vcmask 130048   ;;  %vm2744_vm5 = vcmask 523264   ;;  %vm2747_vm6 = vcmask 785408  }
 0x3fe   : > { %v1234_v9 = vunpack.c.0.s8 %v1233_v8 }
 0x3ff   : > { %1122 = vmatpush1.bf16.msra.mxu0 %v4101_v11  ;;  %3796 = vmatpush3.bf16.msra.mxu1 %v4102_v12  ;;  %v1264_v11 = vunpack.c.l.s4 %v4741_v10  ;;  %v5491_v12 = vpack.i.b16 %v4735_v20, %v4735_v20 }
 0x400   : > { %3797 = vmatprep.subr.bf16.mxu1 %v4734_v58  ;;  %1123 = vmatprep.subr.bf16.mxu0 %v4103_v13 }
 0x402   : > { %p3699_p6 = scmp.ge.s32.totalorder %s6021_s0, 1 }
 0x403   : > { %1124 = vmatpush1.bf16.msra.mxu0 %v4105_v14  ;;  %3798 = vmatpush3.bf16.msra.mxu1 %v4106_v15 }
 0x404   : > { %1125 = vmatprep.subr.bf16.mxu0 %v4107_v16  ;;  %3799 = vmatprep.subr.bf16.mxu1 %v4734_v58 }
 0x407   : > { %1126 = vmatpush1.bf16.msra.mxu0 %v4109_v17  ;;  %3800 = vmatpush3.bf16.msra.mxu1 %v4110_v18  ;;  %v5494_v18 = vsub.s32 %v1234_v9, %v5458_v33 }
 0x408   : > { %1127 = vmatprep.subr.bf16.mxu0 %v4111_v19  ;;  %3801 = vmatprep.subr.bf16.mxu1 %v4734_v58  ;;  %v1265_v19 = vunpack.c.0.s8 %v1264_v11 }
 0x40b   : > { %1128 = vmatpush1.bf16.msra.mxu0 %v4113_v21  ;;  %3802 = vmatpush3.bf16.msra.mxu1 %v4114_v22 }
 0x40c   : > { %1129 = vmatprep.subr.bf16.mxu0 %v4115_v23  ;;  %3803 = vmatprep.subr.bf16.mxu1 %v4734_v58 }
 0x40f   : > { %1130 = vmatpush1.bf16.msra.mxu0 %v4117_v24  ;;  %3804 = vmatpush3.bf16.msra.mxu1 %v4118_v25 }
 0x410   : > { %3809 = vmatprep.subr.bf16.mxu1 %v4734_v58  ;;  %3833 = vmatprep.subr.bf16.mxu0 %v4734_v58 }
 0x481   : > { %v903_v61 = vpop.xlane.xlu0 %902 }
 0x482   : > { %v907_v62 = vmul.f32 0.0078125, %v903_v61 }
 0x484   : > { %v5419_v63 = vsub.f32 %v899_v54, %v907_v62  ;;  %v979_v54 = vrot.slane %v970_v49, %v5467_v39 }
 0x485   : > { %v905_v0 = vpop.xlane.xlu0 %904 }
 0x486   : > { %v908_v1 = vmul.f32 0.0078125, %v905_v0  ;;  %v911_v2 = vmul.f32 %v5419_v63, %v5419_v63 }
 0x488   : > { %v5423_v3 = vsub.f32 %v900_v55, %v908_v1  ;;  %913 = vadd.xlane.f32.xlu1 %v911_v2 }
 0x48a   : > { %v912_v4 = vmul.f32 %v5423_v3, %v5423_v3 }
 0x48c   : > { %915 = vadd.xlane.f32.xlu1 %v912_v4 }
 0x515   : > { %v914_v26 = vpop.xlane.xlu1 %913 }
 0x516   : > { %v917_v27 = vmul.f32 0.0078125, %v914_v26 }
 0x518   : > { %v919_v28 = vadd.f32 1e-05, %v917_v27 }
 0x519   : > { %v916_v29 = vpop.xlane.xlu1 %915 }
 0x51a   : > { %4167 = vrsqrt.f32 %v919_v28  ;;  %v918_v31 = vmul.f32 0.0078125, %v916_v29  ;;  %v5499_v28 = vsub.s32 %v1265_v19, %v5458_v33 }
 0x51c   : > { %v920_v32 = vadd.f32 1e-05, %v918_v31 }
 0x51e   : > { %4169 = vrsqrt.f32 %v920_v32 }
 0x524   : > { %v4168_v36 = vpop.eup %4167 }
 0x525   : > { %v923_v37 = vmul.f32 %v4168_v36, %v5419_v63 }
 0x527   : > { %v929_v42 = vmul.f32 %v928_v38, %v923_v37 }
 0x528   : > { %v4170_v40 = vpop.eup %4169 }
 0x529   : > { %v924_v41 = vmul.f32 %v4170_v40, %v5423_v3  ;;  %v935_v45 = vadd.f32 %v934_v43, %v929_v42 }
 0x52b   : > { %v930_v44 = vmul.f32 %v928_v38, %v924_v41 }
 0x52d   : > { %v936_v46 = vadd.f32 %v934_v43, %v930_v44 }
 0x52f   : > { %v937_v47 = vpack.c.bf16 %v936_v46, %v935_v45 }
 0x531   : > { %1148 = vmatmul.mubr.bf16.vlgmr.msra.gmra.mrb[0].mxu0 %v937_v47  ;;  %3806 = vmatmul.mubr.bf16.vlgmr.msra.gmra.mrb[0].mxu1 %v937_v47 }
 0x532   : > { %3811 = vmatprep.mubr.msk.bf16.mxu1 %vm4736_vm2, %v4734_v58  ;;  %3835 = vmatprep.mubr.msk.bf16.mxu0 %vm4736_vm2, %v4734_v58 }
 0x604   : > { %v1149_v52 = vpop.f32.mrb[0].mxu0  ;;  %v1192_v53 = vpop.f32.mrb[0].mxu1 }
 0x605   : > { %v1151_v55 = vpop.f32.mrb[1].mxu0  ;;  %v3807_v56 = vpop.f32.mrb[1].mxu1  ;;  %v1150_v60 = vadd.f32 %v1149_v52, %v975_v50  ;;  %v1193_v61 = vadd.f32 %v1192_v53, %v983_v51 }
 0x606   : > { %v1153_v57 = vpop.f32.mrb[2].mxu0  ;;  %v1195_v59 = vpop.f32.mrb[2].mxu1  ;;  %v1152_v2 = vadd.f32 %v1151_v55, %v979_v54 }
 0x607   : > { %v1154_v62 = vadd.f32 %v1153_v57, %v975_v50  ;;  %v1196_v63 = vadd.f32 %v1195_v59, %v983_v51  ;;  %v1155_v0 = vpop.f32.mrb[3].mxu0  ;;  %v3808_v1 = vpop.f32.mrb[3].mxu1 }
 0x608   : > { %v1156_v3 = vadd.f32 %v1155_v0, %v979_v54 }
 0x609   : > { %v1199_v4 = vpack.c.bf16 %v1154_v62, %v1150_v60  ;;  %v5481_v5 = vpack.c.bf16 %v1196_v63, %v1193_v61 }
 0x60a   : > { %v1200_v6 = vpack.c.bf16 %v1156_v3, %v1152_v2 }
 0x60b   : > { %v1213_v38 = vshrl.u32 %v1199_v4, 16 }
 0x60c   : > { %1478 = vrot.lane.b32.xlu1 %v1200_v6, %s4737_s4  ;;  %1476 = vrot.lane.b32.xlu0 %v1200_v6, %s4738_s19  ;;  %v1486_v16 = vshrl.u32 %v1200_v6, 16 }
 0x610   : > { %1480 = vrot.lane.b32.xlu1 %v1200_v6, %s4739_s28  ;;  %1205 = vrot.lane.b32.xlu0 %v1199_v4, %s4737_s4 }
 0x614   : > { %1203 = vrot.lane.b32.xlu1 %v1199_v4, %s4738_s19 }
 0x618   : > { %1207 = vrot.lane.b32.xlu1 %v1199_v4, %s4739_s28 }
 0x67e   : > { %v1479_v13 = vpop.permute.xlu1 %1478  ;;  %v1477_v14 = vpop.permute.xlu0 %1476 }
 0x67f   : > { %v1484_v15 = vpack.i.b16 %v1477_v14, %v1200_v6  ;;  %v1487_v17 = vshrl.u32 %v1477_v14, 16  ;;  %v1494_v26 = vshrl.u32 %v1479_v13, 16 }
 0x681   : > { %v1488_v21 = vpack.i.b16 %v1487_v17, %v1486_v16  ;;  %v1498_v22 = vcombine.high %v1484_v15, %v5491_v12  ;;  %v1505_v29 = vrot.slane %v1484_v15, %v5494_v18 }
 0x682   : > { %v1481_v23 = vpop.permute.xlu1 %1480  ;;  %v1206_v62 = vpop.permute.xlu0 %1205 }
 0x683   : > { %v1564_v24 = vcombine.high %v1488_v21, %v5491_v12  ;;  %v1492_v25 = vpack.i.b16 %v1481_v23, %v1479_v13  ;;  %v1495_v27 = vshrl.u32 %v1481_v23, 16  ;;  %v1512_v32 = vrot.slane %v1498_v22, %v5494_v18 }
 0x684   : > { %v1571_v35 = vrot.slane %v1488_v21, %v5494_v18  ;;  %v1221_v8 = vshrl.u32 %v1206_v62, 16 }
 0x685   : > { %v1513_v30 = vcombine.high %v1492_v25, %v5491_v12  ;;  %v1520_v31 = vrot.slane %v1492_v25, %v5494_v18  ;;  %v1496_v36 = vpack.i.b16 %v1495_v27, %v1494_v26  ;;  %v1578_v40 = vrot.slane %v1564_v24, %v5494_v18 }
 0x686   : > { %v1204_v37 = vpop.permute.xlu1 %1203 }
 0x687   : > { %v1527_v41 = vrot.slane %v1513_v30, %v5494_v18  ;;  %v1528_v42 = vcombine.low %v1505_v29, %v1520_v31  ;;  %v1529_v43 = vcombine.high %v1505_v29, %v1520_v31  ;;  %v1579_v44 = vcombine.high %v1496_v36, %v5491_v12 }
 0x688   : > { %v1586_v45 = vrot.slane %v1496_v36, %v5494_v18  ;;  %v1211_v46 = vpack.i.b16 %v1204_v37, %v1199_v4  ;;  %v1214_v47 = vshrl.u32 %v1204_v37, 16 }
 0x689   : > { %v1536_v49 = vrot.slane %v1528_v42, %v5499_v28  ;;  %v1543_v50 = vrot.slane %v1529_v43, %v5499_v28  ;;  %v1544_v51 = vcombine.low %v1512_v32, %v1527_v41  ;;  %v1545_v52 = vcombine.high %v1512_v32, %v1527_v41 }
 0x68a   : > { %v1593_v53 = vrot.slane %v1579_v44, %v5494_v18  ;;  %v1594_v54 = vcombine.low %v1571_v35, %v1586_v45  ;;  %v1595_v55 = vcombine.high %v1571_v35, %v1586_v45  ;;  %v1215_v56 = vpack.i.b16 %v1214_v47, %v1213_v38  ;;  %v1208_v6 = vpop.permute.xlu1 %1207 }
 0x68b   : > { %v1552_v57 = vrot.slane %v1544_v51, %v5499_v28  ;;  %v1559_v59 = vrot.slane %v1545_v52, %v5499_v28  ;;  %v1630_v60 = vcombine.low %v1536_v49, %v1543_v50  ;;  %v3639_v61 = vcombine.high %v1536_v49, %v1543_v50 }
 0x68c   : > { %v1602_v63 = vrot.slane %v1594_v54, %v5499_v28  ;;  %v1609_v0 = vrot.slane %v1595_v55, %v5499_v28  ;;  %v1610_v1 = vcombine.low %v1578_v40, %v1593_v53  ;;  %v1611_v2 = vcombine.high %v1578_v40, %v1593_v53 }
 0x68d   : > { %v1646_v3 = vcombine.low %v1552_v57, %v1559_v59  ;;  %v3640_v4 = vcombine.high %v1552_v57, %v1559_v59  ;;  %v5518_v7 = vrot.slane %v1630_v60, %v5494_v18  ;;  %v1231_v11 = vcombine.high %v1211_v46, %v5491_v12 }
 0x68e   : > { %v1618_v9 = vrot.slane %v1610_v1, %v5499_v28  ;;  %v1625_v10 = vrot.slane %v1611_v2, %v5499_v28  ;;  %v1297_v13 = vcombine.high %v1215_v56, %v5491_v12  ;;  %v1645_v14 = vrot.slane %v3639_v61, %v5494_v18 }
 0x68f   : > { %v1680_v15 = vcombine.low %v1602_v63, %v1609_v0  ;;  %v1219_v16 = vpack.i.b16 %v1208_v6, %v1206_v62  ;;  %v1222_v17 = vshrl.u32 %v1208_v6, 16  ;;  %v3641_v19 = vcombine.high %v1602_v63, %v1609_v0 }
 0x690   : > { %v1238_v21 = vrot.slane %v1211_v46, %v5494_v18  ;;  %v1653_v22 = vrot.slane %v1646_v3, %v5494_v18  ;;  %v1661_v23 = vrot.slane %v3640_v4, %v5494_v18  ;;  %v1304_v24 = vrot.slane %v1215_v56, %v5494_v18 }
 0x691   : > { %v1223_v25 = vpack.i.b16 %v1222_v17, %v1221_v8  ;;  %v1246_v26 = vcombine.high %v1219_v16, %v5491_v12  ;;  %v1253_v27 = vrot.slane %v1219_v16, %v5494_v18  ;;  %v1696_v29 = vcombine.low %v1618_v9, %v1625_v10 }
 0x692   : > { %v3642_v30 = vcombine.high %v1618_v9, %v1625_v10  ;;  %v1245_v31 = vrot.slane %v1231_v11, %v5494_v18  ;;  %v1311_v32 = vrot.slane %v1297_v13, %v5494_v18  ;;  %v1662_v41 = vcombine.low %v5518_v7, %v1645_v14 }
 0x693   : > { %v1260_v35 = vrot.slane %v1246_v26, %v5494_v18  ;;  %v1261_v36 = vcombine.low %v1238_v21, %v1253_v27  ;;  %v1262_v37 = vcombine.high %v1238_v21, %v1253_v27  ;;  %v1312_v38 = vcombine.high %v1223_v25, %v5491_v12 }
 0x694   : > { %v1319_v40 = vrot.slane %v1223_v25, %v5494_v18  ;;  %v1670_v42 = vcombine.low %v1653_v22, %v1661_v23  ;;  %v1687_v43 = vrot.slane %v1680_v15, %v5494_v18  ;;  %v1695_v52 = vrot.slane %v3641_v19, %v5494_v18 }
 0x695   : > { %v1269_v44 = vrot.slane %v1261_v36, %v5499_v28  ;;  %v1276_v45 = vrot.slane %v1262_v37, %v5499_v28  ;;  %v1277_v46 = vcombine.low %v1245_v31, %v1260_v35  ;;  %v1278_v47 = vcombine.high %v1245_v31, %v1260_v35 }
 0x696   : > { %v1326_v49 = vrot.slane %v1312_v38, %v5494_v18  ;;  %v1327_v50 = vcombine.low %v1304_v24, %v1319_v40  ;;  %v1328_v51 = vcombine.high %v1304_v24, %v1319_v40  ;;  %v1703_v55 = vrot.slane %v1696_v29, %v5494_v18 }
 0x697   : > { %v1285_v53 = vrot.slane %v1277_v46, %v5499_v28  ;;  %v1292_v54 = vrot.slane %v1278_v47, %v5499_v28  ;;  %v1711_v56 = vrot.slane %v3642_v30, %v5494_v18  ;;  %v1363_v62 = vcombine.low %v1269_v44, %v1276_v45 }
 0x698   : > { %v1335_v57 = vrot.slane %v1327_v50, %v5499_v28  ;;  %v1342_v59 = vrot.slane %v1328_v51, %v5499_v28  ;;  %v1343_v60 = vcombine.low %v1311_v32, %v1326_v49  ;;  %v1344_v61 = vcombine.high %v1311_v32, %v1326_v49 }
 0x699   : > { %v3635_v63 = vcombine.high %v1269_v44, %v1276_v45  ;;  %v1379_v0 = vcombine.low %v1285_v53, %v1292_v54  ;;  %v3636_v1 = vcombine.high %v1285_v53, %v1292_v54  ;;  %v1712_v9 = vcombine.low %v1687_v43, %v1695_v52 }
 0x69a   : > { %v1351_v2 = vrot.slane %v1343_v60, %v5499_v28  ;;  %v1358_v3 = vrot.slane %v1344_v61, %v5499_v28  ;;  %v1413_v4 = vcombine.low %v1335_v57, %v1342_v59  ;;  %v3637_v6 = vcombine.high %v1335_v57, %v1342_v59 }
 0x69b   : > { %v1386_v7 = vrot.slane %v1379_v0, %v5494_v18  ;;  %v1394_v8 = vrot.slane %v3636_v1, %v5494_v18  ;;  %v1370_v15 = vrot.slane %v1363_v62, %v5494_v18  ;;  %v1378_v16 = vrot.slane %v3635_v63, %v5494_v18 }
 0x69c   : > { %v1420_v10 = vrot.slane %v1413_v4, %v5494_v18  ;;  %v1428_v11 = vrot.slane %v3637_v6, %v5494_v18  ;;  %v1429_v13 = vcombine.low %v1351_v2, %v1358_v3  ;;  %v3638_v14 = vcombine.high %v1351_v2, %v1358_v3 }
 0x69d   : > { %v1677_v17 = vrot.slane %v1670_v42, %v5499_v28  ;;  %v1720_v19 = vcombine.low %v1703_v55, %v1711_v56  ;;  %v1669_v23 = vrot.slane %v1662_v41, %v5499_v28  ;;  %v1403_v24 = vcombine.low %v1386_v7, %v1394_v8 }
 0x69e   : > { %v1436_v21 = vrot.slane %v1429_v13, %v5494_v18  ;;  %v1444_v22 = vrot.slane %v3638_v14, %v5494_v18  ;;  %v1445_v25 = vcombine.low %v1420_v10, %v1428_v11  ;;  %v1719_v26 = vrot.slane %v1712_v9, %v5499_v28 }
 0x69f   : > { %v1727_v27 = vrot.slane %v1720_v19, %v5499_v28  ;;  %v1395_v30 = vcombine.low %v1370_v15, %v1378_v16  ;;  %v1678_v31 = vcombine.low %v1669_v23, %v1677_v17  ;;  %v1410_v37 = vrot.slane %v1403_v24, %v5499_v28 }
 0x6a0   : > { %v1453_v29 = vcombine.low %v1436_v21, %v1444_v22  ;;  %v1452_v38 = vrot.slane %v1445_v25, %v5499_v28  ;;  %v1679_v52 = vcombine.high %v1669_v23, %v1677_v17 }
 0x6a1   : > { %v1728_v32 = vcombine.low %v1719_v26, %v1727_v27  ;;  %v1402_v40 = vrot.slane %v1395_v30, %v5499_v28  ;;  %v1733_v45 = vshrl.u32 %v1678_v31, 16  ;;  %v1729_v50 = vcombine.high %v1719_v26, %v1727_v27 }
 0x6a2   : > { %v1460_v35 = vrot.slane %v1453_v29, %v5499_v28  ;;  %v1739_v60 = vshrl.u32 %v1679_v52, 16 }
 0x6a3   : > { %v1732_v36 = vpack.i.b16 %v1728_v32, %v1678_v31  ;;  %v1734_v43 = vshrl.u32 %v1728_v32, 16  ;;  %v1411_v44 = vcombine.low %v1402_v40, %v1410_v37  ;;  %v1738_v54 = vpack.i.b16 %v1729_v50, %v1679_v52 }
 0x6a4   : > { %v1461_v42 = vcombine.low %v1452_v38, %v1460_v35  ;;  %v1740_v57 = vshrl.u32 %v1729_v50, 16  ;;  %v1462_v59 = vcombine.high %v1452_v38, %v1460_v35  ;;  %v1412_v61 = vcombine.high %v1402_v40, %v1410_v37 }
 0x6a5   : > { %v2018_v41 = vsel %vm2013_vm3, %v1732_v36, 0  ;;  %v1735_v47 = vpack.i.b16 %v1734_v43, %v1733_v45  ;;  %v1466_v53 = vshrl.u32 %v1411_v44, 16  ;;  %v2112_v56 = vsel %vm2013_vm3, %v1738_v54, 0 }
 0x6a6   : > { %3810 = vmatpush3.bf16.xpose.msra.mxu1 %v2018_v41  ;;  %v1465_v46 = vpack.i.b16 %v1461_v42, %v1411_v44  ;;  %v1467_v51 = vshrl.u32 %v1461_v42, 16  ;;  %v1741_v62 = vpack.i.b16 %v1740_v57, %v1739_v60  ;;  %v1471_v63 = vpack.i.b16 %v1462_v59, %v1412_v61 }
 0x6a7   : > { %3815 = vmatprep.subr.bf16.mxu1 %v4734_v58  ;;  %v2065_v49 = vsel %vm2013_vm3, %v1735_v47, 0  ;;  %v1473_v1 = vshrl.u32 %v1462_v59, 16  ;;  %v1472_v2 = vshrl.u32 %v1412_v61, 16 }
 0x6a8   : > { %v1468_v55 = vpack.i.b16 %v1467_v51, %v1466_v53  ;;  %v2159_v0 = vsel %vm2013_vm3, %v1741_v62, 0 }
 0x6a9   : > { %v1474_v3 = vpack.i.b16 %v1473_v1, %v1472_v2 }
 0x6ad   : > { %3812 = vmatmul.mubr.msk.bf16.vlgmr.msra.gmra.mrb[4].mxu1 %vm2013_vm3, %v1465_v46 }
 0x6ae   : > { %3816 = vmatpush3.bf16.xpose.msra.mxu1 %v2065_v49  ;;  %3817 = vmatprep.mubr.msk.bf16.mxu1 %vm4736_vm2, %v4734_v58 }
 0x6af   : > { %3821 = vmatprep.subr.bf16.mxu1 %v4734_v58 }
 0x6b5   : > { %3818 = vmatmul.mubr.msk.bf16.vlgmr.msra.gmra.mrb[8].mxu1 %vm2013_vm3, %v1468_v55 }
 0x6b6   : > { %3822 = vmatpush3.bf16.xpose.msra.mxu1 %v2112_v56  ;;  %3823 = vmatprep.mubr.msk.bf16.mxu1 %vm4736_vm2, %v4734_v58 }
 0x6b7   : > { %3827 = vmatprep.subr.bf16.mxu1 %v4734_v58 }
 0x6bd   : > { %3824 = vmatmul.mubr.msk.bf16.vlgmr.msra.gmra.mrb[12].mxu1 %vm2013_vm3, %v1471_v63 }
 0x6be   : > { %3828 = vmatpush3.bf16.xpose.msra.mxu1 %v2159_v0  ;;  %3829 = vmatprep.mubr.msk.bf16.mxu1 %vm4736_vm2, %v4734_v58 }
 0x6bf   : > { %3839 = vmatprep.subr.bf16.mxu1 %v4734_v58 }
 0x6c5   : > { %3830 = vmatmul.mubr.msk.bf16.vlgmr.msra.gmra.mrb[16].mxu1 %vm2013_vm3, %v1474_v3 }
 0x6c6   : > { %3841 = vmatprep.mubr.msk.bf16.mxu1 %vm4736_vm2, %v4734_v58 }
 0x780   : > { %v2054_v4 = vpop.f32.mrb[4].mxu1 }
 0x781   : > { %v3813_v6 = vpop.f32.mrb[5].mxu1  ;;  %v2203_v7 = vsel %vm2202_vm4, %v2054_v4, -inf }
 0x782   : > { %2204 = vmax.xlane.f32.xlu0 %v2203_v7  ;;  %v2057_v8 = vpop.f32.mrb[6].mxu1 }
 0x783   : > { %v3814_v9 = vpop.f32.mrb[7].mxu1  ;;  %v2206_v10 = vsel %vm2202_vm4, %v2057_v8, -inf }
 0x784   : > { %2207 = vmax.xlane.f32.xlu1 %v2206_v10  ;;  %v1753_v9 = vshrl.u32 %v5481_v5, 16 }
 0x788   : > { %v2101_v11 = vpop.f32.mrb[8].mxu1 }
 0x789   : > { %v3819_v13 = vpop.f32.mrb[9].mxu1  ;;  %v2209_v14 = vsel %vm2202_vm4, %v2101_v11, -inf }
 0x78a   : > { %2210 = vmax.xlane.f32.xlu0 %v2209_v14  ;;  %v2104_v15 = vpop.f32.mrb[10].mxu1 }
 0x78b   : > { %v3820_v16 = vpop.f32.mrb[11].mxu1  ;;  %v2212_v17 = vsel %vm2202_vm4, %v2104_v15, -inf }
 0x78e   : > { %2213 = vmax.xlane.f32.xlu0 %v2212_v17 }
 0x790   : > { %v2148_v19 = vpop.f32.mrb[12].mxu1 }
 0x791   : > { %v3825_v21 = vpop.f32.mrb[13].mxu1  ;;  %v2215_v22 = vsel %vm2202_vm4, %v2148_v19, -inf }
 0x792   : > { %2216 = vmax.xlane.f32.xlu0 %v2215_v22  ;;  %v2151_v23 = vpop.f32.mrb[14].mxu1 }
 0x793   : > { %v3826_v24 = vpop.f32.mrb[15].mxu1  ;;  %v2218_v25 = vsel %vm2202_vm4, %v2151_v23, -inf }
 0x794   : > { %2219 = vmax.xlane.f32.xlu1 %v2218_v25 }
 0x798   : > { %v2195_v26 = vpop.f32.mrb[16].mxu1 }
 0x799   : > { %v3831_v27 = vpop.f32.mrb[17].mxu1  ;;  %v2221_v29 = vsel %vm2202_vm4, %v2195_v26, -inf }
 0x79a   : > { %2222 = vmax.xlane.f32.xlu0 %v2221_v29  ;;  %v2198_v30 = vpop.f32.mrb[18].mxu1 }
 0x79b   : > { %v3832_v31 = vpop.f32.mrb[19].mxu1  ;;  %v2224_v32 = vsel %vm2202_vm4, %v2198_v30, -inf }
 0x79c   : > { %2225 = vmax.xlane.f32.xlu1 %v2224_v32 }
 0x7ad   : > { %1745 = vrot.lane.b32.xlu1 %v5481_v5, %s4737_s4 }
 0x7b0   : > { %1743 = vrot.lane.b32.xlu0 %v5481_v5, %s4738_s19 }
 0x7b1   : > { %1747 = vrot.lane.b32.xlu1 %v5481_v5, %s4739_s28 }
 0x80f   : > { %v2205_v35 = vpop.xlane.xlu0 %2204 }
 0x810   : > { %v2227_v36 = vsub.f32 %v2054_v4, %v2205_v35 }
 0x811   : > { %v2208_v37 = vpop.xlane.xlu1 %2207 }
 0x812   : > { %v2235_v38 = vmul.f32 1.442695, %v2227_v36  ;;  %v2228_v40 = vsub.f32 %v2057_v8, %v2208_v37 }
 0x814   : > { %4171 = vpow2.f32 %v2235_v38  ;;  %v2237_v41 = vmul.f32 1.442695, %v2228_v40 }
 0x816   : > { %4173 = vpow2.f32 %v2237_v41 }
 0x817   : > { %v2211_v42 = vpop.xlane.xlu0 %2210 }
 0x818   : > { %v2229_v43 = vsub.f32 %v2101_v11, %v2211_v42 }
 0x81a   : > { %v2239_v44 = vmul.f32 1.442695, %v2229_v43 }
 0x81b   : > { %v2214_v45 = vpop.xlane.xlu0 %2213 }
 0x81c   : > { %4175 = vpow2.f32 %v2239_v44  ;;  %v2230_v46 = vsub.f32 %v2104_v15, %v2214_v45 }
 0x81e   : > { %v5600_v47 = vpop.eup %4171  ;;  %v2241_v49 = vmul.f32 1.442695, %v2230_v46 }
 0x81f   : > { %v2217_v50 = vpop.xlane.xlu0 %2216  ;;  %v2251_v51 = vsel %vm2202_vm4, %v5600_v47, 0.0 }
 0x820   : > { %v5604_v52 = vpop.eup %4173  ;;  %4177 = vpow2.f32 %v2241_v49  ;;  %v2231_v53 = vsub.f32 %v2148_v19, %v2217_v50  ;;  %2252 = vadd.xlane.f32.xlu1 %v2251_v51 }
 0x821   : > { %v2220_v54 = vpop.xlane.xlu1 %2219  ;;  %v2254_v55 = vsel %vm2202_vm4, %v5604_v52, 0.0 }
 0x822   : > { %v2243_v56 = vmul.f32 1.442695, %v2231_v53  ;;  %v2232_v57 = vsub.f32 %v2151_v23, %v2220_v54  ;;  %2255 = vadd.xlane.f32.xlu0 %v2254_v55 }
 0x824   : > { %4179 = vpow2.f32 %v2243_v56  ;;  %v2245_v59 = vmul.f32 1.442695, %v2232_v57 }
 0x826   : > { %v5608_v60 = vpop.eup %4175  ;;  %4181 = vpow2.f32 %v2245_v59 }
 0x827   : > { %v2223_v61 = vpop.xlane.xlu0 %2222  ;;  %v2257_v62 = vsel %vm2202_vm4, %v5608_v60, 0.0 }
 0x828   : > { %v2233_v63 = vsub.f32 %v2195_v26, %v2223_v61  ;;  %2258 = vadd.xlane.f32.xlu0 %v2257_v62 }
 0x829   : > { %v2226_v0 = vpop.xlane.xlu1 %2225 }
 0x82a   : > { %v5612_v1 = vpop.eup %4177  ;;  %v2247_v2 = vmul.f32 1.442695, %v2233_v63  ;;  %v2234_v3 = vsub.f32 %v2198_v30, %v2226_v0 }
 0x82b   : > { %v1744_v4 = vpop.permute.xlu0 %1743  ;;  %v2260_v6 = vsel %vm2202_vm4, %v5612_v1, 0.0 }
 0x82c   : > { %4183 = vpow2.f32 %v2247_v2  ;;  %v2249_v7 = vmul.f32 1.442695, %v2234_v3  ;;  %v1754_v8 = vshrl.u32 %v1744_v4, 16  ;;  %2261 = vadd.xlane.f32.xlu0 %v2260_v6  ;;  %v1751_v10 = vpack.i.b16 %v1744_v4, %v5481_v5 }
 0x82d   : > { %v1746_v11 = vpop.permute.xlu1 %1745 }
 0x82e   : > { %v5618_v13 = vpop.eup %4179  ;;  %4185 = vpow2.f32 %v2249_v7  ;;  %v1755_v14 = vpack.i.b16 %v1754_v8, %v1753_v9  ;;  %v1765_v17 = vcombine.high %v1751_v10, %v5491_v12  ;;  %v1761_v22 = vshrl.u32 %v1746_v11, 16 }
 0x82f   : > { %v2263_v15 = vsel %vm2202_vm4, %v5618_v13, 0.0  ;;  %v1772_v25 = vrot.slane %v1751_v10, %v5494_v18 }
 0x830   : > { %v5622_v16 = vpop.eup %4181  ;;  %2264 = vadd.xlane.f32.xlu1 %v2263_v15  ;;  %v1831_v24 = vcombine.high %v1755_v14, %v5491_v12  ;;  %v1779_v30 = vrot.slane %v1765_v17, %v5494_v18  ;;  %v1838_v38 = vrot.slane %v1755_v14, %v5494_v18 }
 0x831   : > { %v1748_v19 = vpop.permute.xlu1 %1747  ;;  %v2266_v21 = vsel %vm2202_vm4, %v5622_v16, 0.0 }
 0x832   : > { %v1759_v23 = vpack.i.b16 %v1748_v19, %v1746_v11  ;;  %v1762_v5 = vshrl.u32 %v1748_v19, 16  ;;  %2267 = vadd.xlane.f32.xlu0 %v2266_v21  ;;  %v1845_v40 = vrot.slane %v1831_v24, %v5494_v18 }
 0x834   : > { %v1763_v26 = vpack.i.b16 %v1762_v5, %v1761_v22  ;;  %v1780_v27 = vcombine.high %v1759_v23, %v5491_v12  ;;  %v1787_v29 = vrot.slane %v1759_v23, %v5494_v18 }
 0x836   : > { %v5632_v31 = vpop.eup %4183  ;;  %v1794_v32 = vrot.slane %v1780_v27, %v5494_v18  ;;  %v1795_v35 = vcombine.low %v1772_v25, %v1787_v29  ;;  %v1796_v36 = vcombine.high %v1772_v25, %v1787_v29  ;;  %v1846_v37 = vcombine.high %v1763_v26, %v5491_v12 }
 0x837   : > { %v1853_v41 = vrot.slane %v1763_v26, %v5494_v18  ;;  %v2269_v42 = vsel %vm2202_vm4, %v5632_v31, 0.0 }
 0x838   : > { %v5641_v43 = vpop.eup %4185  ;;  %v1803_v44 = vrot.slane %v1795_v35, %v5499_v28  ;;  %v1810_v45 = vrot.slane %v1796_v36, %v5499_v28  ;;  %v1811_v46 = vcombine.low %v1779_v30, %v1794_v32  ;;  %v1812_v49 = vcombine.high %v1779_v30, %v1794_v32  ;;  %2270 = vadd.xlane.f32.xlu1 %v2269_v42 }
 0x839   : > { %v1860_v50 = vrot.slane %v1846_v37, %v5494_v18  ;;  %v1861_v51 = vcombine.low %v1838_v38, %v1853_v41  ;;  %v1862_v53 = vcombine.high %v1838_v38, %v1853_v41  ;;  %v2272_v54 = vsel %vm2202_vm4, %v5641_v43, 0.0 }
 0x83a   : > { %v1819_v55 = vrot.slane %v1811_v46, %v5499_v28  ;;  %v1826_v56 = vrot.slane %v1812_v49, %v5499_v28  ;;  %v1897_v57 = vcombine.low %v1803_v44, %v1810_v45  ;;  %v3643_v59 = vcombine.high %v1803_v44, %v1810_v45  ;;  %2273 = vadd.xlane.f32.xlu0 %v2272_v54 }
 0x83b   : > { %v1869_v61 = vrot.slane %v1861_v51, %v5499_v28  ;;  %v1876_v62 = vrot.slane %v1862_v53, %v5499_v28  ;;  %v1877_v63 = vcombine.low %v1845_v40, %v1860_v50  ;;  %v1878_v0 = vcombine.high %v1845_v40, %v1860_v50 }
 0x83c   : > { %v1904_v2 = vrot.slane %v1897_v57, %v5494_v18  ;;  %v1912_v3 = vrot.slane %v3643_v59, %v5494_v18  ;;  %v1913_v4 = vcombine.low %v1819_v55, %v1826_v56  ;;  %v3644_v6 = vcombine.high %v1819_v55, %v1826_v56 }
 0x83d   : > { %v1885_v7 = vrot.slane %v1877_v63, %v5499_v28  ;;  %v1892_v8 = vrot.slane %v1878_v0, %v5499_v28  ;;  %v1947_v9 = vcombine.low %v1869_v61, %v1876_v62  ;;  %v3645_v10 = vcombine.high %v1869_v61, %v1876_v62 }
 0x83e   : > { %v1920_v11 = vrot.slane %v1913_v4, %v5494_v18  ;;  %v1928_v14 = vrot.slane %v3644_v6, %v5494_v18  ;;  %v1929_v15 = vcombine.low %v1904_v2, %v1912_v3 }
 0x83f   : > { %v1954_v17 = vrot.slane %v1947_v9, %v5494_v18  ;;  %v1962_v19 = vrot.slane %v3645_v10, %v5494_v18  ;;  %v1963_v21 = vcombine.low %v1885_v7, %v1892_v8  ;;  %v3646_v22 = vcombine.high %v1885_v7, %v1892_v8 }
 0x840   : > { %v1937_v23 = vcombine.low %v1920_v11, %v1928_v14  ;;  %v1936_v26 = vrot.slane %v1929_v15, %v5499_v28 }
 0x841   : > { %v1970_v5 = vrot.slane %v1963_v21, %v5494_v18  ;;  %v1978_v24 = vrot.slane %v3646_v22, %v5494_v18  ;;  %v1979_v25 = vcombine.low %v1954_v17, %v1962_v19  ;;  %v4121_v21 = vld [vmem:[%s5380_s26 + $0x10] sm:$0xff]   ;;  %v4124_v22 = vld [vmem:[%s5380_s26 + $0x28] sm:$0xff]  }
 0x842   : > { %v1944_v27 = vrot.slane %v1937_v23, %v5499_v28 }
 0x843   : > { %v1987_v29 = vcombine.low %v1970_v5, %v1978_v24  ;;  %v1986_v35 = vrot.slane %v1979_v25, %v5499_v28 }
 0x844   : > { %v1945_v30 = vcombine.low %v1936_v26, %v1944_v27  ;;  %v1946_v32 = vcombine.high %v1936_v26, %v1944_v27 }
 0x845   : > { %v1994_v36 = vrot.slane %v1987_v29, %v5499_v28 }
 0x846   : > { %v2001_v40 = vshrl.u32 %v1945_v30, 16  ;;  %v2009_v41 = vshrl.u32 %v1946_v32, 16 }
 0x847   : > { %v1995_v37 = vcombine.low %v1986_v35, %v1994_v36  ;;  %v1996_v38 = vcombine.high %v1986_v35, %v1994_v36 }
 0x849   : > { %v1999_v42 = vpack.i.b16 %v1995_v37, %v1945_v30  ;;  %v2002_v44 = vshrl.u32 %v1995_v37, 16  ;;  %v2007_v45 = vpack.i.b16 %v1996_v38, %v1946_v32  ;;  %v2010_v46 = vshrl.u32 %v1996_v38, 16 }
 0x84b   : > { %3834 = vmatpush3.bf16.msra.mxu0 %v1999_v42  ;;  %v2003_v49 = vpack.i.b16 %v2002_v44, %v2001_v40  ;;  %v2011_v50 = vpack.i.b16 %v2010_v46, %v2009_v41 }
 0x84c   : > { %3845 = vmatprep.subr.bf16.mxu0 %v4734_v58 }
 0x84d   : > { %3840 = vmatpush3.bf16.msra.mxu1 %v2003_v49 }
 0x84e   : > { %3851 = vmatprep.subr.bf16.mxu1 %v4734_v58 }
 0x8ad   : > { %v2253_v51 = vpop.xlane.xlu1 %2252 }
 0x8ae   : > { %4187 = vrcp.f32 %v2253_v51 }
 0x8af   : > { %v2256_v53 = vpop.xlane.xlu0 %2255 }
 0x8b0   : > { %4189 = vrcp.f32 %v2256_v53 }
 0x8b5   : > { %v2259_v54 = vpop.xlane.xlu0 %2258 }
 0x8b6   : > { %4191 = vrcp.f32 %v2259_v54 }
 0x8b8   : > { %v4188_v55 = vpop.eup %4187 }
 0x8b9   : > { %v2262_v56 = vpop.xlane.xlu0 %2261  ;;  %v2283_v59 = vmul.f32 %v4188_v55, %v5600_v47 }
 0x8ba   : > { %v4190_v57 = vpop.eup %4189  ;;  %4193 = vrcp.f32 %v2262_v56 }
 0x8bb   : > { %v2284_v61 = vmul.f32 %v4190_v57, %v5604_v52 }
 0x8bd   : > { %v2265_v62 = vpop.xlane.xlu1 %2264  ;;  %v2291_v63 = vpack.c.bf16 %v2284_v61, %v2283_v59 }
 0x8be   : > { %4195 = vrcp.f32 %v2265_v62 }
 0x8bf   : > { %v2268_v0 = vpop.xlane.xlu0 %2267  ;;  %3836 = vmatmul.mubr.msk.bf16.vlgmr.msra.gmra.mrb[4].mxu0 %vm2202_vm4, %v2291_v63 }
 0x8c0   : > { %4197 = vrcp.f32 %v2268_v0  ;;  %3846 = vmatpush3.bf16.msra.mxu0 %v2007_v45  ;;  %3847 = vmatprep.mubr.msk.bf16.mxu0 %vm4736_vm2, %v4734_v58  ;;  %v4192_v2 = vpop.eup %4191 }
 0x8c1   : > { %3857 = vmatprep.subr.bf16.mxu0 %v4734_v58  ;;  %v2285_v4 = vmul.f32 %v4192_v2, %v5608_v60 }
 0x8c4   : > { %v4194_v3 = vpop.eup %4193 }
 0x8c5   : > { %v2286_v47 = vmul.f32 %v4194_v3, %v5612_v1  ;;  %v2271_v52 = vpop.xlane.xlu1 %2270 }
 0x8c6   : > { %4199 = vrcp.f32 %v2271_v52 }
 0x8c7   : > { %v2274_v6 = vpop.xlane.xlu0 %2273  ;;  %v2292_v7 = vpack.c.bf16 %v2286_v47, %v2285_v4 }
 0x8c8   : > { %v4196_v8 = vpop.eup %4195  ;;  %4201 = vrcp.f32 %v2274_v6 }
 0x8c9   : > { %3842 = vmatmul.mubr.msk.bf16.vlgmr.msra.gmra.mrb[20].mxu1 %vm2202_vm4, %v2292_v7  ;;  %v2287_v10 = vmul.f32 %v4196_v8, %v5618_v13  ;;  %v4119_v13 = vld [vmem:[%s5380_s26] sm:$0xff]  }
 0x8ca   : > { %v4198_v9 = vpop.eup %4197  ;;  %3852 = vmatpush3.bf16.msra.mxu1 %v2011_v50  ;;  %3853 = vmatprep.mubr.msk.bf16.mxu1 %vm4736_vm2, %v4734_v58 }
 0x8cb   : > { %v2288_v60 = vmul.f32 %v4198_v9, %v5622_v16  ;;  %v4120_v16 = vld [vmem:[%s5380_s26 + $0x8] sm:$0xff]  }
 0x8cd   : > { %v2293_v1 = vpack.c.bf16 %v2288_v60, %v2287_v10 }
 0x8cf   : > { %3848 = vmatmul.mubr.msk.bf16.vlgmr.msra.gmra.mrb[8].mxu0 %vm2202_vm4, %v2293_v1 }
 0x8d0   : > { %v4200_v11 = vpop.eup %4199  ;;  %3873 = vmatprep.mubr.msk.bf16.mxu0 %vm4736_vm2, %v4734_v58  ;;  %3858 = vmatpush3.bf16.msra.mxu0 %v4119_v13 }
 0x8d1   : > { %v2289_v15 = vmul.f32 %v4200_v11, %v5632_v31  ;;  %3859 = vmatprep.subr.bf16.mxu0 %v4734_v58  ;;  %v4122_v31 = vld [vmem:[%s5380_s26 + $0x18] sm:$0xff]  }
 0x8d2   : > { %v4202_v14 = vpop.eup %4201 }
 0x8d3   : > { %v2290_v17 = vmul.f32 %v4202_v14, %v5641_v43  ;;  %v4123_v43 = vld [vmem:[%s5380_s26 + $0x20] sm:$0xff]  }
 0x8d4   : > { %3860 = vmatpush3.bf16.msra.mxu0 %v4120_v16 }
 0x8d5   : > { %v2294_v19 = vpack.c.bf16 %v2290_v17, %v2289_v15  ;;  %3861 = vmatprep.subr.bf16.mxu0 %v4734_v58 }
 0x8d7   : > { %3854 = vmatmul.mubr.msk.bf16.vlgmr.msra.gmra.mrb[24].mxu1 %vm2202_vm4, %v2294_v19 }
 0x8d8   : > { %3039 = vmatprep.mubr.bf16.mxu1 %v4735_v20  ;;  %3862 = vmatpush3.bf16.msra.mxu0 %v4121_v21 }
 0x8d9   : > { %3863 = vmatprep.subr.bf16.mxu0 %v4734_v58 }
 0x8dc   : > { %3864 = vmatpush3.bf16.msra.mxu0 %v4122_v31 }
 0x8dd   : > { %3865 = vmatprep.subr.bf16.mxu0 %v4734_v58 }
 0x8e0   : > { %3866 = vmatpush3.bf16.msra.mxu0 %v4123_v43 }
 0x8e1   : > { %3867 = vmatprep.subr.bf16.mxu0 %v4734_v58 }
 0x8e4   : > { %3868 = vmatpush3.bf16.msra.mxu0 %v4124_v22 }
 0x8e5   : > { %3869 = vmatprep.subr.bf16.mxu0 %v4734_v58 }
 0x992   : > { %v2332_v20 = vpop.f32.mrb[4].mxu0 }
 0x993   : > { %v3837_v23 = vpop.f32.mrb[5].mxu0 }
 0x994   : > { %v2335_v5 = vpop.f32.mrb[6].mxu0 }
 0x995   : > { %v2471_v24 = vpack.c.bf16 %v2335_v5, %v2332_v20  ;;  %v3838_v25 = vpop.f32.mrb[7].mxu0 }
 0x997   : > { %v2479_v35 = vshrl.u32 %v2471_v24, 16 }
 0x99c   : > { %v2376_v26 = vpop.f32.mrb[20].mxu1 }
 0x99d   : > { %v3843_v27 = vpop.f32.mrb[21].mxu1 }
 0x99e   : > { %v2379_v29 = vpop.f32.mrb[22].mxu1 }
 0x99f   : > { %v2472_v30 = vpack.c.bf16 %v2379_v29, %v2376_v26  ;;  %v3844_v32 = vpop.f32.mrb[23].mxu1 }
 0x9a1   : > { %v2477_v36 = vpack.i.b16 %v2472_v30, %v2471_v24  ;;  %v2480_v37 = vshrl.u32 %v2472_v30, 16  ;;  %v4125_v24 = vld [vmem:[%s5380_s26 + $0x30] sm:$0xff]  }
 0x9a2   : > { %v2420_v38 = vpop.f32.mrb[8].mxu0  ;;  %3870 = vmatpush3.bf16.msra.mxu0 %v4125_v24 }
 0x9a3   : > { %v2481_v40 = vpack.i.b16 %v2480_v37, %v2479_v35  ;;  %v3849_v41 = vpop.f32.mrb[9].mxu0  ;;  %v2491_v54 = vcombine.high %v2477_v36, %v5491_v12  ;;  %v2498_v59 = vrot.slane %v2477_v36, %v5494_v18  ;;  %3871 = vmatprep.subr.bf16.mxu0 %v4734_v58 }
 0x9a4   : > { %v2423_v42 = vpop.f32.mrb[10].mxu0 }
 0x9a5   : > { %v2473_v44 = vpack.c.bf16 %v2423_v42, %v2420_v38  ;;  %v3850_v45 = vpop.f32.mrb[11].mxu0  ;;  %v2505_v0 = vrot.slane %v2491_v54, %v5494_v18  ;;  %v2557_v2 = vcombine.high %v2481_v40, %v5491_v12  ;;  %v2564_v6 = vrot.slane %v2481_v40, %v5494_v18  ;;  %v4126_v42 = vld [vmem:[%s5380_s26 + $0x38] sm:$0xff]  }
 0x9a6   : > { %3872 = vmatpush3.bf16.msra.mxu0 %v4126_v42  ;;  %v4150_v42 = vld [vmem:[%s5386_s10 + $0x74] ss:$8 sps:$4 sm:$0xff]  }
 0x9a7   : > { %v2487_v55 = vshrl.u32 %v2473_v44, 16  ;;  %v2571_v1 = vrot.slane %v2557_v2, %v5494_v18 }
 0x9aa   : > { %v2464_v46 = vpop.f32.mrb[24].mxu1 }
 0x9ab   : > { %v3855_v49 = vpop.f32.mrb[25].mxu1 }
 0x9ac   : > { %v2467_v50 = vpop.f32.mrb[26].mxu1 }
 0x9ad   : > { %v2474_v51 = vpack.c.bf16 %v2467_v50, %v2464_v46  ;;  %v3856_v53 = vpop.f32.mrb[27].mxu1 }
 0x9af   : > { %v2485_v56 = vpack.i.b16 %v2474_v51, %v2473_v44  ;;  %v2488_v57 = vshrl.u32 %v2474_v51, 16 }
 0x9b1   : > { %v2489_v61 = vpack.i.b16 %v2488_v57, %v2487_v55  ;;  %v2506_v62 = vcombine.high %v2485_v56, %v5491_v12  ;;  %v2513_v63 = vrot.slane %v2485_v56, %v5494_v18 }
 0x9b3   : > { %v2520_v3 = vrot.slane %v2506_v62, %v5494_v18  ;;  %v2521_v4 = vcombine.low %v2498_v59, %v2513_v63  ;;  %v2522_v47 = vcombine.high %v2498_v59, %v2513_v63  ;;  %v2572_v52 = vcombine.high %v2489_v61, %v5491_v12 }
 0x9b4   : > { %v2579_v7 = vrot.slane %v2489_v61, %v5494_v18 }
 0x9b5   : > { %v2529_v8 = vrot.slane %v2521_v4, %v5499_v28  ;;  %v2536_v9 = vrot.slane %v2522_v47, %v5499_v28  ;;  %v2537_v10 = vcombine.low %v2505_v0, %v2520_v3  ;;  %v2538_v60 = vcombine.high %v2505_v0, %v2520_v3 }
 0x9b6   : > { %v2586_v11 = vrot.slane %v2572_v52, %v5494_v18  ;;  %v2587_v14 = vcombine.low %v2564_v6, %v2579_v7  ;;  %v2588_v15 = vcombine.high %v2564_v6, %v2579_v7 }
 0x9b7   : > { %v2545_v17 = vrot.slane %v2537_v10, %v5499_v28  ;;  %v2552_v12 = vrot.slane %v2538_v60, %v5499_v28  ;;  %v2623_v19 = vcombine.low %v2529_v8, %v2536_v9  ;;  %v3655_v13 = vcombine.high %v2529_v8, %v2536_v9  ;;  %v5740_v8 = vld [vmem:[%s5396_s20] sm:$0x3f]  ;;  %v4208_v60 = vld [vmem:[%s5404_s7] sm:$0xff] }
 0x9b8   : > { %v2595_v16 = vrot.slane %v2587_v14, %v5499_v28  ;;  %v2602_v21 = vrot.slane %v2588_v15, %v5499_v28  ;;  %v2603_v31 = vcombine.low %v2571_v1, %v2586_v11  ;;  %v2604_v43 = vcombine.high %v2571_v1, %v2586_v11 }
 0x9b9   : > { %v2639_v22 = vcombine.low %v2545_v17, %v2552_v12  ;;  %v3656_v20 = vcombine.high %v2545_v17, %v2552_v12  ;;  %v2630_v23 = vrot.slane %v2623_v19, %v5494_v18  ;;  %v2638_v5 = vrot.slane %v3655_v13, %v5494_v18  ;;  %v4209_v17 = vld [vmem:[%s5404_s7 + $0x8] sm:$0xff] }
 0x9ba   : > { %v2611_v25 = vrot.slane %v2603_v31, %v5499_v28  ;;  %v2618_v26 = vrot.slane %v2604_v43, %v5499_v28  ;;  %v2673_v27 = vcombine.low %v2595_v16, %v2602_v21  ;;  %v3657_v29 = vcombine.high %v2595_v16, %v2602_v21  ;;  %v4127_v16 = vld [vmem:[%s5386_s10] ss:$8 sps:$4 sm:$0xff]   ;;  %v4129_v21 = vld [vmem:[%s5386_s10 + $0x4] ss:$8 sps:$4 sm:$0xff]   ;;  %v4130_v31 = vld [vmem:[%s5386_s10 + $0x10] ss:$8 sps:$4 sm:$0xff]  }
 0x9bb   : > { %v2646_v30 = vrot.slane %v2639_v22, %v5494_v18  ;;  %v2654_v32 = vrot.slane %v3656_v20, %v5494_v18  ;;  %v2655_v35 = vcombine.low %v2630_v23, %v2638_v5  ;;  %v2861_v9 = vrot.slane %v5740_v8, %v982_v48  ;;  %v4132_v48 = vld [vmem:[%s5386_s10 + $0x14] ss:$8 sps:$4 sm:$0xff]   ;;  %3007 = vmatprep.subr.bf16.mxu1 %v4129_v21  ;;  %v2915_v21 = vld [vmem:[%s5388_s12] sm:$0x3] }
 0x9bc   : > { %v2680_v36 = vrot.slane %v2673_v27, %v5494_v18  ;;  %v2688_v37 = vrot.slane %v3657_v29, %v5494_v18  ;;  %v2689_v38 = vcombine.low %v2611_v25, %v2618_v26  ;;  %v3658_v40 = vcombine.high %v2611_v25, %v2618_v26  ;;  %3008 = vmatpush1.bf16.msra.mxu1 %v4127_v16  ;;  %v4135_v27 = vld [vmem:[%s5386_s10 + $0x24] ss:$8 sps:$4 sm:$0xff]   ;;  %v4133_v29 = vld [vmem:[%s5386_s10 + $0x20] ss:$8 sps:$4 sm:$0xff]  }
 0x9bd   : > { %v2663_v41 = vcombine.low %v2646_v30, %v2654_v32  ;;  %v2662_v49 = vrot.slane %v2655_v35, %v5499_v28  ;;  %3009 = vmatprep.subr.bf16.mxu1 %v4132_v48  ;;  %v4138_v30 = vld [vmem:[%s5386_s10 + $0x34] ss:$8 sps:$4 sm:$0xff]   ;;  %v4136_v32 = vld [vmem:[%s5386_s10 + $0x30] ss:$8 sps:$4 sm:$0xff]   ;;  %v4141_v35 = vld [vmem:[%s5386_s10 + $0x44] ss:$8 sps:$4 sm:$0xff]   ;;  %v2920_v48 = vrot.slane %v2915_v21, %v5461_v34 }
 0x9be   : > { %v2696_v44 = vrot.slane %v2689_v38, %v5494_v18  ;;  %v2704_v45 = vrot.slane %v3658_v40, %v5494_v18  ;;  %v2705_v46 = vcombine.low %v2680_v36, %v2688_v37  ;;  %v4139_v36 = vld [vmem:[%s5386_s10 + $0x40] ss:$8 sps:$4 sm:$0xff]   ;;  %v4144_v37 = vld [vmem:[%s5386_s10 + $0x54] ss:$8 sps:$4 sm:$0xff]   ;;  %v4142_v38 = vld [vmem:[%s5386_s10 + $0x50] ss:$8 sps:$4 sm:$0xff]  }
 0x9bf   : > { %v2670_v50 = vrot.slane %v2663_v41, %v5499_v28  ;;  %v4147_v40 = vld [vmem:[%s5386_s10 + $0x64] ss:$8 sps:$4 sm:$0xff]   ;;  %v4145_v41 = vld [vmem:[%s5386_s10 + $0x60] ss:$8 sps:$4 sm:$0xff]  }
 0x9c0   : > { %v2713_v51 = vcombine.low %v2696_v44, %v2704_v45  ;;  %v2712_v55 = vrot.slane %v2705_v46, %v5499_v28  ;;  %3010 = vmatpush1.bf16.msra.mxu1 %v4130_v31  ;;  %v4148_v44 = vld [vmem:[%s5386_s10 + $0x70] ss:$8 sps:$4 sm:$0xff]   ;;  %v4151_v45 = vld [vmem:[%s5394_s5 + $0x40] sm:$0xff]   ;;  %v4166_v16 = vld [vmem:[%s5394_s5 + $0x38] sm:$0xff]   ;;  %v2924_v31 = vrot.slane %v2915_v21, %v5467_v39 }
 0x9c1   : > { %v2672_v53 = vcombine.high %v2662_v49, %v2670_v50  ;;  %v2671_v54 = vcombine.low %v2662_v49, %v2670_v50  ;;  %3011 = vmatprep.subr.bf16.mxu1 %v4135_v27  ;;  %v4152_v46 = vld [vmem:[%s5394_s5] sm:$0xff]   ;;  %v4153_v49 = vld [vmem:[%s5394_s5 + $0x48] sm:$0xff]   ;;  %3755 = vmatprep.subr.bf16.mxu0 %v4151_v45 }
 0x9c2   : > { %v2720_v56 = vrot.slane %v2713_v51, %v5499_v28  ;;  %v4154_v50 = vld [vmem:[%s5394_s5 + $0x8] sm:$0xff]   ;;  %v4155_v51 = vld [vmem:[%s5394_s5 + $0x50] sm:$0xff]  }
 0x9c3   : > { %v2726_v59 = vshrl.u32 %v2671_v54, 16  ;;  %v2732_v61 = vshrl.u32 %v2672_v53, 16 }
 0x9c4   : > { %v2722_v58 = vcombine.high %v2712_v55, %v2720_v56  ;;  %v2721_v57 = vcombine.low %v2712_v55, %v2720_v56  ;;  %3012 = vmatpush1.bf16.msra.mxu1 %v4133_v29  ;;  %v4158_v55 = vld [vmem:[%s5394_s5 + $0x18] sm:$0xff]   ;;  %v4159_v56 = vld [vmem:[%s5394_s5 + $0x60] sm:$0xff]  }
 0x9c5   : > { %3013 = vmatprep.subr.bf16.mxu1 %v4138_v30 }
 0x9c6   : > { %v2731_v62 = vpack.i.b16 %v2722_v58, %v2672_v53  ;;  %v2727_v63 = vshrl.u32 %v2721_v57, 16  ;;  %v2733_v18 = vshrl.u32 %v2722_v58, 16  ;;  %v2725_v0 = vpack.i.b16 %v2721_v57, %v2671_v54  ;;  %v4156_v53 = vld [vmem:[%s5394_s5 + $0x10] sm:$0xff]   ;;  %v4157_v54 = vld [vmem:[%s5394_s5 + $0x58] sm:$0xff]   ;;  %v4160_v58 = vld [vmem:[%s5394_s5 + $0x20] sm:$0xff]  }
 0x9c7   : > { %v4161_v57 = vld [vmem:[%s5394_s5 + $0x68] sm:$0xff]  }
 0x9c8   : > { %2737 = vrot.lane.b32.xlu0 %v2731_v62, %s4737_s4  ;;  %v2728_v2 = vpack.i.b16 %v2727_v63, %v2726_v59  ;;  %v2734_v3 = vpack.i.b16 %v2733_v18, %v2732_v61  ;;  %3014 = vmatpush1.bf16.msra.mxu1 %v4136_v32 }
 0x9c9   : > { %3015 = vmatprep.subr.bf16.mxu1 %v4141_v35 }
 0x9ca   : > { %2735 = vrot.lane.b32.xlu1 %v2728_v2, %s4739_s28  ;;  %v2888_v2 = vsub.s32 3, %v5458_v33 }
 0x9cc   : > { %3016 = vmatpush1.bf16.msra.mxu1 %v4139_v36 }
 0x9cd   : > { %3017 = vmatprep.subr.bf16.mxu1 %v4144_v37  ;;  %v3090_v37 = vsub.s32 5, %v5458_v33 }
 0x9ce   : > { %2739 = vrot.lane.b32.xlu1 %v2734_v3, %s4738_s19  ;;  %v2889_v3 = vrot.slane %v5740_v8, %v2888_v2 }
 0x9d0   : > { %3018 = vmatpush1.bf16.msra.mxu1 %v4142_v38 }
 0x9d1   : > { %3019 = vmatprep.subr.bf16.mxu1 %v4147_v40  ;;  %v3091_v40 = vrot.slane %v5740_v8, %v3090_v37 }
 0x9d4   : > { %3020 = vmatpush1.bf16.msra.mxu1 %v4145_v41 }
 0x9d5   : > { %3021 = vmatprep.subr.bf16.mxu1 %v4150_v42 }
 0x9d8   : > { %3022 = vmatpush1.bf16.msra.mxu1 %v4148_v44 }
 0xa3a   : > { %v2738_v47 = vpop.permute.xlu0 %2737 }
 0xa3c   : > { %v2736_v4 = vpop.permute.xlu1 %2735 }
 0xa3d   : > { %v2743_v28 = vsel %vm2013_vm3, %v2725_v0, %v2736_v4  ;;  %v2894_v4 = vsub.s32 4, %v5458_v33 }
 0xa3e   : > { %v2746_v6 = vsel %vm2744_vm5, %v2743_v28, %v2738_v47 }
 0xa40   : > { %v2740_v52 = vpop.permute.xlu1 %2739 }
 0xa41   : > { %v2749_v7 = vsel %vm2747_vm6, %v2746_v6, %v2740_v52 }
 0xa42   : > { %3874 = vmatmul.mubr.bf16.vlgmr.msra.gmra.mrb[12].mxu0 %v2749_v7 }
 0xa43   : > { %3756 = vmatpush3.bf16.msra.mxu0 %v4152_v46 }
 0xa44   : > { %3757 = vmatprep.subr.bf16.mxu0 %v4153_v49 }
 0xa47   : > { %3758 = vmatpush3.bf16.msra.mxu0 %v4154_v50 }
 0xa48   : > { %3759 = vmatprep.subr.bf16.mxu0 %v4155_v51 }
 0xa4b   : > { %3760 = vmatpush3.bf16.msra.mxu0 %v4156_v53 }
 0xa4c   : > { %3761 = vmatprep.subr.bf16.mxu0 %v4157_v54 }
 0xa4f   : > { %3762 = vmatpush3.bf16.msra.mxu0 %v4158_v55 }
 0xa50   : > { %3763 = vmatprep.subr.bf16.mxu0 %v4159_v56 }
 0xa53   : > { %3764 = vmatpush3.bf16.msra.mxu0 %v4160_v58 }
 0xa54   : > { %3765 = vmatprep.subr.bf16.mxu0 %v4161_v57 }
 0xb15   : > { %v2849_v10 = vpop.f32.mrb[12].mxu0 }
 0xb16   : > { %v2856_v1 = vadd.f32 %v4208_v60, %v2849_v10  ;;  %v3875_v11 = vpop.f32.mrb[13].mxu0 }
 0xb17   : > { %v2852_v14 = vpop.f32.mrb[14].mxu0 }
 0xb18   : > { %v5746_v15 = vadd.f32 %v2861_v9, %v2856_v1  ;;  %v2857_v12 = vadd.f32 %v4209_v17, %v2852_v14  ;;  %v3876_v19 = vpop.f32.mrb[15].mxu0  ;;  %v4162_v14 = vld [vmem:[%s5394_s5 + $0x28] sm:$0xff]   ;;  %v4163_v17 = vld [vmem:[%s5394_s5 + $0x70] sm:$0xff]  }
 0xb19   : > { %3766 = vmatpush3.bf16.msra.mxu0 %v4162_v14  ;;  %v4165_v19 = vld [vmem:[%s5394_s5 + $0x78] sm:$0xff]  }
 0xb1a   : > { %v5749_v13 = vadd.f32 %v2861_v9, %v2857_v12  ;;  %2864 = vadd.xlane.f32.xlu1 %v5746_v15  ;;  %v2895_v9 = vrot.slane %v5740_v8, %v2894_v4  ;;  %v4164_v12 = vld [vmem:[%s5394_s5 + $0x30] sm:$0xff]   ;;  %3767 = vmatprep.subr.bf16.mxu0 %v4163_v17 }
 0xb1c   : > { %2866 = vadd.xlane.f32.xlu0 %v5749_v13 }
 0xb1d   : > { %3768 = vmatpush3.bf16.msra.mxu0 %v4164_v12 }
 0xb1e   : > { %3769 = vmatprep.subr.bf16.mxu0 %v4165_v19 }
 0xb21   : > { %3770 = vmatpush3.bf16.msra.mxu0 %v4166_v16 }
 0xba7   : > { %v2865_v43 = vpop.xlane.xlu1 %2864 }
 0xba8   : > { %v2868_v22 = vmul.f32 0.0078125, %v2865_v43 }
 0xba9   : > { %v2867_v20 = vpop.xlane.xlu0 %2866 }
 0xbaa   : > { %v5758_v23 = vsub.f32 %v5746_v15, %v2868_v22  ;;  %v2869_v5 = vmul.f32 0.0078125, %v2867_v20 }
 0xbac   : > { %v5761_v24 = vsub.f32 %v5749_v13, %v2869_v5  ;;  %v2872_v25 = vmul.f32 %v5758_v23, %v5758_v23 }
 0xbae   : > { %2874 = vadd.xlane.f32.xlu0 %v2872_v25  ;;  %v2873_v26 = vmul.f32 %v5761_v24, %v5761_v24 }
 0xbb0   : > { %2876 = vadd.xlane.f32.xlu1 %v2873_v26 }
 0xc3b   : > { %v2875_v59 = vpop.xlane.xlu0 %2874 }
 0xc3c   : > { %v2878_v61 = vmul.f32 0.0078125, %v2875_v59 }
 0xc3d   : > { %v2877_v62 = vpop.xlane.xlu1 %2876 }
 0xc3e   : > { %v2880_v63 = vadd.f32 1e-05, %v2878_v61  ;;  %v2879_v18 = vmul.f32 0.0078125, %v2877_v62 }
 0xc40   : > { %4203 = vrsqrt.f32 %v2880_v63  ;;  %v2881_v0 = vadd.f32 1e-05, %v2879_v18 }
 0xc42   : > { %4205 = vrsqrt.f32 %v2881_v0 }
 0xc4a   : > { %v4204_v28 = vpop.eup %4203 }
 0xc4b   : > { %v2884_v47 = vmul.f32 %v4204_v28, %v5758_v23 }
 0xc4c   : > { %v4206_v52 = vpop.eup %4205 }
 0xc4d   : > { %v2885_v6 = vmul.f32 %v4206_v52, %v5761_v24  ;;  %v2890_v7 = vmul.f32 %v2889_v3, %v2884_v47 }
 0xc4f   : > { %v2891_v10 = vmul.f32 %v2889_v3, %v2885_v6  ;;  %v2896_v60 = vadd.f32 %v2895_v9, %v2890_v7 }
 0xc51   : > { %v2897_v1 = vadd.f32 %v2895_v9, %v2891_v10 }
 0xc53   : > { %v2898_v11 = vpack.c.bf16 %v2897_v1, %v2896_v60 }
 0xc55   : > { %3040 = vmatmul.mubr.bf16.vlgmr.msra.gmra.mrb[28].mxu1 %v2898_v11 }
 0xd28   : > { %v3041_v43 = vpop.f32.mrb[28].mxu1 }
 0xd29   : > { %v3042_v22 = vadd.f32 %v3041_v43, %v2920_v48  ;;  %v3043_v20 = vpop.f32.mrb[29].mxu1 }
 0xd2a   : > { %v3044_v23 = vadd.f32 %v3043_v20, %v2924_v31  ;;  %v3045_v5 = vpop.f32.mrb[30].mxu1 }
 0xd2b   : > { %v3046_v24 = vadd.f32 %v3045_v5, %v2920_v48  ;;  %v3047_v25 = vpop.f32.mrb[31].mxu1  ;;  %v3050_v27 = vmax.f32 %v3042_v22, 0.0 }
 0xd2c   : > { %v3048_v26 = vadd.f32 %v3047_v25, %v2924_v31  ;;  %v3051_v30 = vmax.f32 %v3044_v23, 0.0 }
 0xd2d   : > { %v3052_v29 = vmax.f32 %v3046_v24, 0.0 }
 0xd2e   : > { %v3053_v32 = vmax.f32 %v3048_v26, 0.0 }
 0xd2f   : > { %v3054_v35 = vpack.c.bf16 %v3052_v29, %v3050_v27 }
 0xd30   : > { %v3055_v36 = vpack.c.bf16 %v3053_v32, %v3051_v30 }
 0xd32   : > { %3220 = vmatprep.mubr.bf16.mxu0 %v3055_v36 }
 0xd33   : > { %3221 = vmatmul.mubr.bf16.vlgmr.msra.gmra.mrb[16].mxu0 %v3054_v35 }
 0xe06   : > { %v3771_v38 = vpop.f32.mrb[16].mxu0 }
 0xe07   : > { %v3772_v41 = vpop.f32.mrb[17].mxu0 }
 0xe08   : > { %v3773_v42 = vadd.f32 %v3772_v41, %v3771_v38  ;;  %v3774_v44 = vpop.f32.mrb[18].mxu0  ;;  %3234 = sbr.rel (%p3699_p6) target bundleno = 3601 (0xe11), region = 124 }
 0xe09   : > { %v3775_v45 = vpop.f32.mrb[19].mxu0 }
 0xe0a   : > { %v3223_v46 = vadd.f32 %v3773_v42, %v3091_v40  ;;  %v3776_v49 = vadd.f32 %v3775_v45, %v3774_v44 }
 0xe0c   : > { %v3229_v50 = vadd.f32 %v3223_v46, %v5746_v15  ;;  %v3226_v51 = vadd.f32 %v3776_v49, %v3091_v40 }
 0xe0e   : > { %v3230_v53 = vadd.f32 %v3226_v51, %v5749_v13  ;;  %3235 = vst [vmem:[%s5404_s7] sm:$0xff] (!%p3699_p6), %v3229_v50 }
 0xe10   : > { %3236 = vst [vmem:[%s5404_s7 + $0x8] sm:$0xff] %v3230_v53 }
 0xe11 PF: > { %s6022_s18 = sld [smem:[#allocation34_spill]] }
 0xe17   : > { %p3700_p2 = scmp.ne.s32.totalorder %s6022_s18, 1 }
 0xe18   : > { %3242 = vadd.xlane.f32.xlu0 (!%p3700_p2), %v3229_v50  ;;  %v3241_v0 = vld [vmem:[#allocation10] sm:$0x3] (!%p3700_p2) }
 0xe19   : > { %3240 = sbr.rel (%p3700_p2) target bundleno = 3924 (0xf54), region = 128  ;;  %v3267_v2 = vrot.slane (!%p3700_p2), %v3241_v0, %v5461_v34  ;;  %v3273_v28 = vrot.slane (!%p3700_p2), %v3241_v0, %v5467_v39 }
 0xe1c   : > { %3244 = vadd.xlane.f32.xlu0 (!%p3700_p2), %v3230_v53 }
 0xea5   : > { %v3243_v33 = vpop.xlane.xlu0 %3242 }
 0xea6   : > { %v3246_v8 = vmul.f32 0.0078125, %v3243_v33 }
 0xea8   : > { %v3248_v54 = vsub.f32 %v3229_v50, %v3246_v8 }
 0xea9   : > { %v3245_v15 = vpop.xlane.xlu0 %3244 }
 0xeaa   : > { %v3247_v55 = vmul.f32 0.0078125, %v3245_v15  ;;  %v3250_v56 = vmul.f32 %v3248_v54, %v3248_v54 }
 0xeac   : > { %v3249_v13 = vsub.f32 %v3230_v53, %v3247_v55  ;;  %3252 = vadd.xlane.f32.xlu1 %v3250_v56 }
 0xeae   : > { %v3251_v58 = vmul.f32 %v3249_v13, %v3249_v13 }
 0xeb0   : > { %3254 = vadd.xlane.f32.xlu1 %v3251_v58 }
 0xf39   : > { %v3253_v57 = vpop.xlane.xlu1 %3252 }
 0xf3a   : > { %v3256_v59 = vmul.f32 0.0078125, %v3253_v57 }
 0xf3c   : > { %v3258_v61 = vadd.f32 1e-05, %v3256_v59 }
 0xf3d   : > { %v3255_v62 = vpop.xlane.xlu1 %3254 }
 0xf3e   : > { %4210 = vrsqrt.f32 %v3258_v61  ;;  %v3257_v63 = vmul.f32 0.0078125, %v3255_v62 }
 0xf40   : > { %v3259_v18 = vadd.f32 1e-05, %v3257_v63 }
 0xf42   : > { %4212 = vrsqrt.f32 %v3259_v18 }
 0xf48   : > { %v4211_v3 = vpop.eup %4210 }
 0xf49   : > { %v3262_v4 = vmul.f32 %v4211_v3, %v3248_v54 }
 0xf4b   : > { %v3268_v47 = vmul.f32 %v3267_v2, %v3262_v4 }
 0xf4c   : > { %v4213_v52 = vpop.eup %4212 }
 0xf4d   : > { %v3274_v6 = vadd.f32 %v3273_v28, %v3268_v47  ;;  %v3263_v7 = vmul.f32 %v4213_v52, %v3249_v13 }
 0xf4f   : > { %3276 = vst [vmem:[%s5404_s7] sm:$0xff] %v3274_v6  ;;  %v3269_v9 = vmul.f32 %v3267_v2, %v3263_v7 }
 0xf51   : > { %v3275_v10 = vadd.f32 %v3273_v28, %v3269_v9 }
 0xf53   : > { %3277 = vst [vmem:[%s5404_s7 + $0x8] sm:$0xff] %v3275_v10 }
 0xf54 PF: > { %s6023_s3 = sld [smem:[#allocation35_spill]]  ;;  %s6024_s1 = sld [smem:[#allocation55_spill]] }
 0xf55   : > { %s3292_s14 = sshll.u32 %s5404_s7, 4  ;;  %s3279_s6 = scalar_lea.sflag [#allocation4], %s5350_s11  ;;  %s5823_s14 = int_to_ptr.vmem [resolvable:$true] %s3292_s14 }
 0xf56   : > { %s4566_s10 = scalar_lea.vmem %s5823_s14, 256  ;;  %p6025_p3 = scmp.ne.s32.totalorder %s5990_s15, 0 }
 0xf57   : > { %p4567_p0 = scmp.ne.s32.totalorder %s5823_s14, %s4566_s10  ;;  %s4742_s30 = smov [#allocation22]  }
 0xf58   : > { %s4570_s12 = sshll.u32 %s4742_s30, 4  ;;  %s4571_s12 = int_to_ptr.vmem [resolvable:$false] %s4570_s12 }
 0xf59   : > { %p4568_p5 = pnand %p4567_p0, %p6025_p3  ;;  %s4572_s21 = scalar_lea.vmem %s4571_s12, 512 }
 0xf5a   : > { %s3711_s9 = sshll.u32 %s6023_s3, 8  ;;  %p4573_p11 = scmp.lt.s32.totalorder %s5823_s14, %s4571_s12 }
 0xf5b   : > { %s5820_s26 = scalar_lea.hbm %s6024_s1, %s3711_s9  ;;  %p4569_p12 = pneg %p4568_p5 }
 0xf5c   : > { %p4574_p4 = scmp.lt.s32.totalorder %s4572_s21, %s4566_s10 }
 0xf5e   : > { %p4575_p9 = por %p4574_p4, %p4573_p11 }
 0xf60   : > { %p4576_p13 = pnand %p4575_p9, %p4569_p12 }
 0xf62   : > { %4579 = shalt.err (!%p4576_p13)
}
 0xf63   : > { %s4580_s5 = scalar_lea.hbm %s5820_s26, 256  ;;  %s4584_s7 = scalar_lea.hbm %s6024_s1, 512 }
 0xf64   : > { %p4581_p7 = scmp.ne.s32.totalorder %s5820_s26, %s4580_s5  ;;  %p4585_p10 = scmp.lt.u32.totalorder %s5820_s26, %s6024_s1 }
 0xf65   : > { %p4586_p6 = scmp.lt.u32.totalorder %s4584_s7, %s4580_s5  ;;  %p4588_p0 = scmp.lt.u32.totalorder %s4580_s5, %s5820_s26 }
 0xf66   : > { %p4582_p8 = pnand %p4581_p7, %p6025_p3 }
 0xf67   : > { %p4587_p2 = por %p4586_p6, %p4585_p10 }
 0xf68   : > { %p4583_p1 = pneg %p4582_p8 }
 0xf69   : > { %p4589_p5 = por %p4588_p0, %p4587_p2 }
 0xf6b   : > { %p4590_p12 = pnand %p4589_p5, %p4583_p1 }
 0xf6d   : > { %4593 = shalt.err (!%p4590_p12)
}
 0xf6e   : > { %s4743_s19 = smov 128   ;;  %s4744_s28 = smov 8  }
 0xf6f   : > { %3915 = dma.vmem_to_hbm [thread:$0]  (%p6025_p3), %s5823_s14, 256, %s5820_s26, %s3279_s6, %s4743_s19, %s4743_s19, %s4744_s28  }
 0xf70 PF: > { %p3968_p11 = scmp.ge.s32.totalorder %s4712_s13, 2  ;;  %s3307_s0 = sand.u32 1, %s4684_s24  }
 0xf71   : > { %p6026_p4 = scmp.ne.s32.totalorder %s5993_s17, 0  ;;  %s3308_s18 = scalar_lea.sflag [#allocation4], %s3307_s0 }
 0xf73   : > { %p3956_p9 = pnand %p3968_p11, %p6026_p4 }
 0xf75   : > { %4667 = dma.done.wait (!%p3956_p9), %s3308_s18, 256  }
 0xf76   : > { %4669 = vsyncadd (!%p3956_p9), %s3308_s18, 4294967040  ;;  %s42_s13 = sadd.s32 1, %s4712_s13   ;;  %s6027_s21 = sld [smem:[#allocation31_spill]] }
 0xf77   : > { %p39_p13 = scmp.ge.s32.totalorder %s42_s13, 6   ;;  %s6028_s22 = sld [smem:[#allocation32_spill]] }
 0xf78   : > { %s6029_s23 = sld [smem:[#allocation41_spill]]  ;;  %s6030_s15 = sld [smem:[#allocation33_spill]] }
 0xf79   : > { %s6031_s26 = sld [smem:[#allocation42_spill]]  ;;  %s6032_s28 = sld [smem:[#allocation36_spill]] }
 0xf7a   : > { %s6033_s11 = sld [smem:[#allocation39_spill]]  ;;  %s6034_s30 = sld [smem:[#allocation40_spill]] }
 0xf7b   : > { %s6035_s24 = smov %s4688_s25  ;;  %s6037_s27 = smov %s4704_s29 }
 0xf7c   :  { %41 = sbr.rel (!%p39_p13) target bundleno = 33 (0x21), region = 226 }
 0xf7e   : > { %s6036_s25 = smov %s6030_s15 }
 0xf80   : > { %s6038_s29 = smov %s6033_s11 }
 0xf83   :  { %3313 = vsyncpa [#allocation3], 1 }
 0xf84   :  { %3315 = vsyncpa [#allocation3 + $0x1], 1 }
 0xf85   :  { %3316 = vsyncpa [#allocation6], 1 }
 0xf86   :  { %3317 = vsyncpa [#allocation9], 1 }
 0xf87   :  { %3318 = vsyncpa [#allocation12], 1 }
 0xf88   :  { %3320 = vsyncpa [#allocation12 + $0x1], 1 }
 0xf89   :  { %3321 = vsyncpa [#allocation15], 1 }
 0xf8a   :  { %3323 = vsyncpa [#allocation15 + $0x1], 1 }
 0xf8b   :  { %3324 = vsyncpa [#allocation18], 1 }
 0xf8c   :  { %3326 = vsyncpa [#allocation18 + $0x1], 1 }
 0xf8d   :  { %3327 = vsyncpa [#allocation21], 1 }
 0xf8e   :  { %3329 = vsyncpa [#allocation21 + $0x1], 1 }
 0xf8f   :  { %3330 = vsyncpa [#allocation4], 1 }
 0xf90   :  { %3332 = vsyncpa [#allocation4 + $0x1], 1 }

</bundles_post_ra>
